<compile_context>
chip_gen: v5e
topology: v5e:2x2
jax: 0.10.0
libtpu: 0.0.40
codegen_flags: <defaults>
</compile_context>

<pallas_src>
import functools
import math

import jax
import jax.numpy as jnp
from jax.experimental import pallas as pl
from jax.experimental.pallas import tpu as pltpu


# ---------------------------------------------------------------------------
# Fused kernel: one (image, output-row-tile) per grid step
# ---------------------------------------------------------------------------
def _up_fused_kernel(x_ref, uw_ref, ub_ref, w1_ref, b1_ref, w2_ref, b2_ref, o_ref,
                     *, fuse_k):
    """Lane-dense layout: rows on sublanes, (width*channels) flattened on the lane axis.

    x_ref : (1, H_in+2, Lin_pad)  bf16 input image, zero row-padded (1 top / 1 bottom),
                                  row width W*Cin zero-padded to a multiple of 128 lanes
    uw_ref: (Lin_pad, 2*Lf)       bf16 flattened ConvTranspose2d weights, cols = (d, w_out, cout)
    ub_ref: (1, 2*Lf)             f32 ConvTranspose2d bias, tiled
    w1/w2 : (3*Lf, Lf)            bf16 block-Toeplitz conv weights (W zero-pad + BN scale folded),
                                  the three kh taps stacked along K
    b1/b2 : (1, Lf)               f32 folded BN shift, tiled
    o_ref : (1, THo, Lf)          f32 this tile's output rows
    """
    t = pl.program_id(1)
    tho = o_ref.shape[1]          # output rows per tile
    thi = tho // 2                # input rows per tile
    h_in = x_ref.shape[1] - 2
    h_out = 2 * h_in
    lf = o_ref.shape[2]

    def conv3(src, m, w_ref, b_ref):
        # src rows a, a+1, a+2 (kh = 0, 1, 2) feed output row a.
        if fuse_k:
            k_in = jnp.concatenate([src[0:m], src[1:m + 1], src[2:m + 2]], axis=1)  # (m, 3*Lf)
            acc = jnp.dot(k_in, w_ref[...], preferred_element_type=jnp.float32)
        else:
            w = w_ref[...]
            acc = jnp.dot(src[0:m], w[0:lf], preferred_element_type=jnp.float32)
            acc = acc + jnp.dot(src[1:m + 1], w[lf:2 * lf], preferred_element_type=jnp.float32)
            acc = acc + jnp.dot(src[2:m + 2], w[2 * lf:3 * lf], preferred_element_type=jnp.float32)
        return jnp.maximum(acc + b_ref[...], 0.0)

    # ---- ConvTranspose2d(k=2, s=2): one bf16 matmul; row interleave = row-major reshape ----
    start = t * thi
    mult = math.gcd(thi, 8)
    if mult > 1:
        start = pl.multiple_of(start, mult)
    x_rows = x_ref[0, pl.ds(start, thi + 2), :]                       # (thi+2, Lin_pad), incl. halo
    y = jnp.dot(x_rows, uw_ref[...], preferred_element_type=jnp.float32)
    y = (y + ub_ref[...]).reshape(tho + 4, lf)                        # upsampled rows r0 .. r0+tho+3

    # rows outside the upsampled image act as conv1's zero row-padding
    r0 = 2 * t * thi - 2                                              # global row of local row 0
    g = r0 + jax.lax.broadcasted_iota(jnp.int32, (tho + 4, 1), 0)
    y = jnp.where((g >= 0) & (g < h_out), y, 0.0).astype(jnp.bfloat16)

    # ---- Conv3x3 + BN + ReLU (1): rows r0+1 .. r0+tho+2 (includes conv2's row halo) --------
    m1 = tho + 2
    c1 = conv3(y, m1, w1_ref, b1_ref)
    g1 = (r0 + 1) + jax.lax.broadcasted_iota(jnp.int32, (m1, 1), 0)
    c1 = jnp.where((g1 >= 0) & (g1 < h_out), c1, 0.0).astype(jnp.bfloat16)  # conv2's zero rows

    # ---- Conv3x3 + BN + ReLU (2): this tile's output rows -----------------------------------
    o_ref[0, :, :] = conv3(c1, tho, w2_ref, b2_ref).astype(o_ref.dtype)


# ---------------------------------------------------------------------------
# Parameter folding into lane-dense matmul operands (tiny, done once by XLA)
# ---------------------------------------------------------------------------
def _fold_bn(w_oihw, gamma, beta, mean, var, eps=1e-5):
    """Fold eval-mode BatchNorm into conv weights/bias -> (w_hwio_scaled, bias)."""
    scale = gamma / jnp.sqrt(var + eps)
    w_hwio = jnp.transpose(w_oihw, (2, 3, 1, 0)) * scale              # (3, 3, Cin, Cout)
    return w_hwio, beta - mean * scale


def _conv3x3_toeplitz(w_hwio, w_out):
    """(3,3,Cin,Cout) -> (3*w_out*Cin, w_out*Cout) stacked block-Toeplitz matrix.

    big[kh*Lin + p*Cin + i, w*Cout + o] = w[kh, kw, i, o] with p = w + kw - 1
    (width zero-padding folded in, kh taps stacked along K for the fused K=3*Lf dot).
    """
    _, _, cin, cout = w_hwio.shape
    p = jnp.arange(w_out)
    sel = (p[None, :, None] ==
           (jnp.arange(w_out)[None, None, :] + jnp.arange(3)[:, None, None] - 1)
           ).astype(w_hwio.dtype)                                     # (3, w_out, w_out)
    big = jnp.einsum('kpw,hkio->hpiwo', sel, w_hwio)                  # (3, w_out, cin, w_out, cout)
    return big.reshape(3 * w_out * cin, w_out * cout)


def _upconv_flat(w_t, bias, w_in, l_in_pad):
    """ConvTranspose2d(k=2,s=2) weights (Cin,Cout,2,2) -> (Lin_pad, 2*(2*w_in*Cout)) matrix.

    Column order (d, v, o): output row 2h+d, output col v, out-channel o, so the kernel's
    row-major reshape of the matmul result performs the row interleave.  K is zero-row-padded
    to the lane-aligned input width.
    """
    cin, cout, _, _ = w_t.shape
    v = jnp.arange(2 * w_in)
    place = (v[None, None, :] ==
             (2 * jnp.arange(w_in)[:, None, None] + jnp.arange(2)[None, :, None])
             ).astype(w_t.dtype)                                      # (w_in, 2, 2*w_in)
    u = jnp.einsum('wjv,codj->wcdvo', place, w_t).reshape(w_in * cin, 2 * 2 * w_in * cout)
    u = jnp.pad(u, ((0, l_in_pad - w_in * cin), (0, 0)))
    b = jnp.tile(bias, 2 * 2 * w_in).reshape(1, 2 * 2 * w_in * cout)
    return u, b


# ---------------------------------------------------------------------------
# Public wrapper (NCHW in / NCHW out, like PyTorch)
# ---------------------------------------------------------------------------
def up_forward(x_nchw, p, *, max_tile_out_rows=128, fuse_k=True):
    n, cin, h, w = x_nchw.shape
    cout = p['up_w'].shape[1]
    assert p['up_w'].shape[0] == cin
    assert p['c1_w'].shape[1] == cout, "module requires in_channels == out_channels"
    h_out, w_out = 2 * h, 2 * w
    l_in = w * cin                                  # flattened input row width
    l_in_pad = ((l_in + 127) // 128) * 128          # lane-aligned (unmasked vregs)
    l_f = w_out * cout                              # flattened output row width (lane axis)
    if l_f > 512:
        raise NotImplementedError(
            "block-Toeplitz path only sized for W_out*C <= 512 "
            "(TODO(synk): width-tiled / channels-on-lanes layout)")

    # --- choose input-row tile size (output rows per tile = 2*thi) -------------------
    cap = max(1, min(h, max_tile_out_rows // 2))
    thi = h                                         # fallback is legal: block == full dim
    for cand in range(cap, 0, -1):
        if h % cand == 0 and (2 * cand) % 8 == 0:
            thi = cand
            break
    tho = 2 * thi
    n_tiles = h // thi

    # --- fold parameters; bf16 MXU operands -------------------------------------------
    uw, ub = _upconv_flat(p['up_w'], p['up_b'], w, l_in_pad)
    uw = uw.astype(jnp.bfloat16)
    w1_hwio, b1 = _fold_bn(p['c1_w'], p['bn1_g'], p['bn1_b'], p['bn1_m'], p['bn1_v'])
    w2_hwio, b2 = _fold_bn(p['c2_w'], p['bn2_g'], p['bn2_b'], p['bn2_m'], p['bn2_v'])
    w1_big = _conv3x3_toeplitz(w1_hwio, w_out).astype(jnp.bfloat16)   # (3*Lf, Lf)
    w2_big = _conv3x3_toeplitz(w2_hwio, w_out).astype(jnp.bfloat16)
    b1_flat = jnp.tile(b1, w_out).reshape(1, l_f)
    b2_flat = jnp.tile(b2, w_out).reshape(1, l_f)

    # --- flatten, lane-pad and 1-row zero pad the (small, pre-upsample) input ----------
    x_flat = jnp.transpose(x_nchw, (0, 2, 3, 1)).reshape(n, h, l_in)
    x_flat = jnp.pad(x_flat, ((0, 0), (1, 1), (0, l_in_pad - l_in))).astype(jnp.bfloat16)

    # --- VMEM budget from actual block sizes (double-buffered) + headroom --------------
    def nbytes(shape, dt):
        return math.prod(shape) * jnp.dtype(dt).itemsize

    block_bytes = (nbytes((1, h + 2, l_in_pad), jnp.bfloat16)
                   + nbytes((l_in_pad, 2 * l_f), jnp.bfloat16)
                   + nbytes((1, 2 * l_f), jnp.float32)
                   + 2 * nbytes((3 * l_f, l_f), jnp.bfloat16)
                   + 2 * nbytes((1, l_f), jnp.float32)
                   + nbytes((1, tho, l_f), jnp.float32))
    vmem_limit = int(min(max(2 * block_bytes + (4 << 20), 16 << 20), 64 << 20))

    flops = 2 * n * n_tiles * ((thi + 2) * l_in_pad * (2 * l_f)
                               + (tho + 2) * (3 * l_f) * l_f
                               + tho * (3 * l_f) * l_f)
    bytes_accessed = (x_flat.size * 2 + n * h_out * l_f * 4
                      + (uw.size + w1_big.size + w2_big.size) * 2
                      + (ub.size + b1_flat.size + b2_flat.size) * 4)

    out_flat = pl.pallas_call(
        functools.partial(_up_fused_kernel, fuse_k=fuse_k),
        grid=(n, n_tiles),
        in_specs=[
            # whole (small) padded image per batch; constant over t -> fetched once, stays in VMEM
            pl.BlockSpec((1, h + 2, l_in_pad), lambda i, t: (i, 0, 0)),
            # weights/biases: constant index_maps -> DMA'd once and kept resident
            pl.BlockSpec((l_in_pad, 2 * l_f), lambda i, t: (0, 0)),
            pl.BlockSpec((1, 2 * l_f), lambda i, t: (0, 0)),
            pl.BlockSpec((3 * l_f, l_f), lambda i, t: (0, 0)),
            pl.BlockSpec((1, l_f), lambda i, t: (0, 0)),
            pl.BlockSpec((3 * l_f, l_f), lambda i, t: (0, 0)),
            pl.BlockSpec((1, l_f), lambda i, t: (0, 0)),
        ],
        out_specs=pl.BlockSpec((1, tho, l_f), lambda i, t: (i, t, 0)),
        out_shape=jax.ShapeDtypeStruct((n, h_out, l_f), jnp.float32),
        compiler_params=pltpu.CompilerParams(
            dimension_semantics=("parallel", "parallel"),
            vmem_limit_bytes=vmem_limit),
        cost_estimate=pl.CostEstimate(flops=flops, transcendentals=0,
                                      bytes_accessed=bytes_accessed),
    )(x_flat, uw, ub, w1_big, b1_flat, w2_big, b2_flat)

    out = out_flat.reshape(n, h_out, w_out, cout)                     # free row-major split
    # NOTE: NHWC consumers should take `out` directly; this transpose is an extra HBM round
    # trip kept only to match the PyTorch NCHW contract.
    return jnp.transpose(out, (0, 3, 1, 2))


# ---------------------------------------------------------------------------
# Pure-JAX reference (sanity check only)
# ---------------------------------------------------------------------------
def _ref_conv_bn_relu(x, w_oihw, g, b, m, v, eps=1e-5):
    w_hwio = jnp.transpose(w_oihw, (2, 3, 1, 0))
    y = jax.lax.conv_general_dilated(x, w_hwio, (1, 1), 'SAME',
                                     dimension_numbers=('NHWC', 'HWIO', 'NHWC'))
    scale = g / jnp.sqrt(v + eps)
    return jnp.maximum(y * scale + (b - m * scale), 0.0)


def _ref_forward(x_nchw, p):
    x = jnp.transpose(x_nchw, (0, 2, 3, 1))
    n, h, w, _ = x.shape
    cout = p['up_w'].shape[1]
    y = jnp.einsum('nhwc,coij->nhiwjo', x, p['up_w']) + p['up_b']
    y = y.reshape(n, 2 * h, 2 * w, cout)
    y = _ref_conv_bn_relu(y, p['c1_w'], p['bn1_g'], p['bn1_b'], p['bn1_m'], p['bn1_v'])
    y = _ref_conv_bn_relu(y, p['c2_w'], p['bn2_g'], p['bn2_b'], p['bn2_m'], p['bn2_v'])
    return jnp.transpose(y, (0, 3, 1, 2))


# ---------------------------------------------------------------------------
if __name__ == "__main__":
    key = jax.random.PRNGKey(0)
    C = 4                       # in_channels == out_channels (required by module as written)
    N, H, W = 2, 16, 16
    ks = jax.random.split(key, 9)

    x = jax.random.normal(ks[0], (N, C, H, W), jnp.float32)
    params = {
        # ConvTranspose2d(C, C, 2, 2): weight (Cin, Cout, 2, 2), bias (Cout,)
        'up_w': 0.3 * jax.random.normal(ks[1], (C, C, 2, 2), jnp.float32),
        'up_b': 0.1 * jax.random.normal(ks[2], (C,), jnp.float32),
        # DoubleConv conv1 (Cout, Cin, 3, 3) + BN1 (eval-mode running stats)
        'c1_w': 0.3 * jax.random.normal(ks[3], (C, C, 3, 3), jnp.float32),
        'bn1_g': 1.0 + 0.1 * jax.random.normal(ks[4], (C,), jnp.float32),
        'bn1_b': 0.1 * jax.random.normal(ks[5], (C,), jnp.float32),
        'bn1_m': jnp.zeros((C,), jnp.float32),
        'bn1_v': jnp.ones((C,), jnp.float32),
        # DoubleConv conv2 (Cout, Cout, 3, 3) + BN2
        'c2_w': 0.3 * jax.random.normal(ks[6], (C, C, 3, 3), jnp.float32),
        'bn2_g': 1.0 + 0.1 * jax.random.normal(ks[7], (C,), jnp.float32),
        'bn2_b': 0.1 * jax.random.normal(ks[8], (C,), jnp.float32),
        'bn2_m': jnp.zeros((C,), jnp.float32),
        'bn2_v': jnp.ones((C,), jnp.float32),
    }

    fwd = jax.jit(up_forward, static_argnames=("max_tile_out_rows", "fuse_k"))

    out_tiled = jax.block_until_ready(fwd(x, params, max_tile_out_rows=16))   # 2 row-tiles (halo path)
    out_whole = jax.block_until_ready(fwd(x, params))                         # 1 row-tile per image
    out_3dot = jax.block_until_ready(fwd(x, params, max_tile_out_rows=16,
                                         fuse_k=False))                       # v5e-style 3-dot form
    ref = jax.block_until_ready(_ref_forward(x, params))

    assert out_tiled.shape == (N, C, 2 * H, 2 * W), out_tiled.shape
    assert out_whole.shape == (N, C, 2 * H, 2 * W), out_whole.shape
    for name, out in (("tiled", out_tiled), ("whole", out_whole), ("3dot", out_3dot)):
        max_err = float(jnp.max(jnp.abs(out - ref)))
        assert jnp.allclose(out, ref, atol=5e-2, rtol=5e-2), f"{name}: max_err={max_err}"

    print("KERNEL_OK")
</pallas_src>

<mosaic_0001>
module attributes {stable_mosaic.version = 11 : i64} {
  func.func @_up_fused_kernel(%arg0: i32, %arg1: i32, %arg2: memref<1x18x128xbf16, #tpu.memory_space<vmem>>, %arg3: memref<128x256xbf16, #tpu.memory_space<vmem>>, %arg4: memref<1x256xf32, #tpu.memory_space<vmem>>, %arg5: memref<384x128xbf16, #tpu.memory_space<vmem>>, %arg6: memref<1x128xf32, #tpu.memory_space<vmem>>, %arg7: memref<384x128xbf16, #tpu.memory_space<vmem>>, %arg8: memref<1x128xf32, #tpu.memory_space<vmem>>, %arg9: memref<1x16x128xf32, #tpu.memory_space<vmem>>) attributes {dimension_semantics = [#tpu.dimension_semantics<parallel>, #tpu.dimension_semantics<parallel>], iteration_bounds = array<i64: 2, 2>, scalar_prefetch = 0 : i64, scratch_operands = 0 : i64, tpu.core_type = #tpu.core_type<tc>, window_params = [{transform_indices = @transform_0, window_bounds = array<i64: 1, 18, 128>}, {pipeline_mode = #tpu.pipeline_mode<synchronous>, transform_indices = @transform_1, window_bounds = array<i64: 128, 256>}, {pipeline_mode = #tpu.pipeline_mode<synchronous>, transform_indices = @transform_2, window_bounds = array<i64: 1, 256>}, {pipeline_mode = #tpu.pipeline_mode<synchronous>, transform_indices = @transform_3, window_bounds = array<i64: 384, 128>}, {pipeline_mode = #tpu.pipeline_mode<synchronous>, transform_indices = @transform_4, window_bounds = array<i64: 1, 128>}, {pipeline_mode = #tpu.pipeline_mode<synchronous>, transform_indices = @transform_5, window_bounds = array<i64: 384, 128>}, {pipeline_mode = #tpu.pipeline_mode<synchronous>, transform_indices = @transform_6, window_bounds = array<i64: 1, 128>}, {transform_indices = @transform_7, window_bounds = array<i64: 1, 16, 128>}]} {
    %c8_i32 = arith.constant 8 : i32
    %0 = arith.muli %arg1, %c8_i32 : i32
    %1 = tpu.assume_multiple %0, 8 : i32
    %c0 = arith.constant 0 : index
    %2 = arith.index_cast %1 : i32 to index
    %c0_0 = arith.constant 0 : index
    %3 = vector.load %arg2[%c0, %2, %c0_0] : memref<1x18x128xbf16, #tpu.memory_space<vmem>>, vector<1x10x128xbf16>
    %4 = vector.shape_cast %3 : vector<1x10x128xbf16> to vector<10x128xbf16>
    %c0_1 = arith.constant 0 : index
    %c0_2 = arith.constant 0 : index
    %5 = vector.load %arg3[%c0_1, %c0_2] : memref<128x256xbf16, #tpu.memory_space<vmem>>, vector<128x256xbf16>
    %cst = arith.constant dense<0.000000e+00> : vector<10x256xf32>
    %6 = tpu.matmul %4, %5, %cst {dimension_numbers = #tpu.dot_dimension_numbers<[1], [0], [0], [1], [0, 0, 1, 1], [], []>} : vector<10x128xbf16>, vector<128x256xbf16>, vector<10x256xf32> -> vector<10x256xf32>
    %c0_3 = arith.constant 0 : index
    %c0_4 = arith.constant 0 : index
    %7 = vector.load %arg4[%c0_3, %c0_4] : memref<1x256xf32, #tpu.memory_space<vmem>>, vector<1x256xf32>
    %8 = vector.broadcast %7 : vector<1x256xf32> to vector<10x256xf32>
    %9 = arith.addf %6, %8 : vector<10x256xf32>
    %10 = vector.shape_cast %9 : vector<10x256xf32> to vector<20x128xf32>
    %c2_i32 = arith.constant 2 : i32
    %11 = arith.muli %c2_i32, %arg1 : i32
    %c8_i32_5 = arith.constant 8 : i32
    %12 = arith.muli %11, %c8_i32_5 : i32
    %c2_i32_6 = arith.constant 2 : i32
    %13 = arith.subi %12, %c2_i32_6 : i32
    %14 = tpu.iota {dimensions = array<i32: 0>} : vector<20x1xi32>
    %15 = vector.broadcast %13 : i32 to vector<20x1xi32>
    %16 = arith.addi %15, %14 : vector<20x1xi32>
    %c0_i32 = arith.constant 0 : i32
    %17 = vector.broadcast %c0_i32 : i32 to vector<20x1xi32>
    %18 = arith.cmpi sge, %16, %17 : vector<20x1xi32>
    %c32_i32 = arith.constant 32 : i32
    %19 = vector.broadcast %c32_i32 : i32 to vector<20x1xi32>
    %20 = arith.cmpi slt, %16, %19 : vector<20x1xi32>
    %21 = arith.andi %18, %20 : vector<20x1xi1>
    %cst_7 = arith.constant 0.000000e+00 : f32
    %22 = vector.shape_cast %21 : vector<20x1xi1> to vector<20x1xi1>
    %23 = vector.broadcast %22 : vector<20x1xi1> to vector<20x128xi1>
    %24 = vector.broadcast %cst_7 : f32 to vector<20x128xf32>
    %25 = arith.select %23, %10, %24 : vector<20x128xi1>, vector<20x128xf32>
    %26 = arith.truncf %25 : vector<20x128xf32> to vector<20x128xbf16>
    %27 = vector.extract_strided_slice %26 {offsets = [0, 0], sizes = [18, 128], strides = [1, 1]} : vector<20x128xbf16> to vector<18x128xbf16>
    %28 = vector.extract_strided_slice %26 {offsets = [1, 0], sizes = [18, 128], strides = [1, 1]} : vector<20x128xbf16> to vector<18x128xbf16>
    %29 = vector.extract_strided_slice %26 {offsets = [2, 0], sizes = [18, 128], strides = [1, 1]} : vector<20x128xbf16> to vector<18x128xbf16>
    %30 = tpu.concatenate %27, %28, %29 in 1 : vector<18x128xbf16>, vector<18x128xbf16>, vector<18x128xbf16> -> vector<18x384xbf16>
    %c0_8 = arith.constant 0 : index
    %c0_9 = arith.constant 0 : index
    %31 = vector.load %arg5[%c0_8, %c0_9] : memref<384x128xbf16, #tpu.memory_space<vmem>>, vector<384x128xbf16>
    %cst_10 = arith.constant dense<0.000000e+00> : vector<18x128xf32>
    %32 = tpu.matmul %30, %31, %cst_10 {dimension_numbers = #tpu.dot_dimension_numbers<[1], [0], [0], [1], [0, 0, 1, 1], [], []>} : vector<18x384xbf16>, vector<384x128xbf16>, vector<18x128xf32> -> vector<18x128xf32>
    %c0_11 = arith.constant 0 : index
    %c0_12 = arith.constant 0 : index
    %33 = vector.load %arg6[%c0_11, %c0_12] : memref<1x128xf32, #tpu.memory_space<vmem>>, vector<1x128xf32>
    %34 = vector.broadcast %33 : vector<1x128xf32> to vector<18x128xf32>
    %35 = arith.addf %32, %34 : vector<18x128xf32>
    %cst_13 = arith.constant 0.000000e+00 : f32
    %36 = vector.broadcast %cst_13 : f32 to vector<18x128xf32>
    %37 = arith.maximumf %35, %36 : vector<18x128xf32>
    %c1_i32 = arith.constant 1 : i32
    %38 = arith.addi %13, %c1_i32 : i32
    %39 = tpu.iota {dimensions = array<i32: 0>} : vector<18x1xi32>
    %40 = vector.broadcast %38 : i32 to vector<18x1xi32>
    %41 = arith.addi %40, %39 : vector<18x1xi32>
    %c0_i32_14 = arith.constant 0 : i32
    %42 = vector.broadcast %c0_i32_14 : i32 to vector<18x1xi32>
    %43 = arith.cmpi sge, %41, %42 : vector<18x1xi32>
    %c32_i32_15 = arith.constant 32 : i32
    %44 = vector.broadcast %c32_i32_15 : i32 to vector<18x1xi32>
    %45 = arith.cmpi slt, %41, %44 : vector<18x1xi32>
    %46 = arith.andi %43, %45 : vector<18x1xi1>
    %cst_16 = arith.constant 0.000000e+00 : f32
    %47 = vector.shape_cast %46 : vector<18x1xi1> to vector<18x1xi1>
    %48 = vector.broadcast %47 : vector<18x1xi1> to vector<18x128xi1>
    %49 = vector.broadcast %cst_16 : f32 to vector<18x128xf32>
    %50 = arith.select %48, %37, %49 : vector<18x128xi1>, vector<18x128xf32>
    %51 = arith.truncf %50 : vector<18x128xf32> to vector<18x128xbf16>
    %52 = vector.extract_strided_slice %51 {offsets = [0, 0], sizes = [16, 128], strides = [1, 1]} : vector<18x128xbf16> to vector<16x128xbf16>
    %53 = vector.extract_strided_slice %51 {offsets = [1, 0], sizes = [16, 128], strides = [1, 1]} : vector<18x128xbf16> to vector<16x128xbf16>
    %54 = vector.extract_strided_slice %51 {offsets = [2, 0], sizes = [16, 128], strides = [1, 1]} : vector<18x128xbf16> to vector<16x128xbf16>
    %55 = tpu.concatenate %52, %53, %54 in 1 : vector<16x128xbf16>, vector<16x128xbf16>, vector<16x128xbf16> -> vector<16x384xbf16>
    %c0_17 = arith.constant 0 : index
    %c0_18 = arith.constant 0 : index
    %56 = vector.load %arg7[%c0_17, %c0_18] : memref<384x128xbf16, #tpu.memory_space<vmem>>, vector<384x128xbf16>
    %cst_19 = arith.constant dense<0.000000e+00> : vector<16x128xf32>
    %57 = tpu.matmul %55, %56, %cst_19 {dimension_numbers = #tpu.dot_dimension_numbers<[1], [0], [0], [1], [0, 0, 1, 1], [], []>} : vector<16x384xbf16>, vector<384x128xbf16>, vector<16x128xf32> -> vector<16x128xf32>
    %c0_20 = arith.constant 0 : index
    %c0_21 = arith.constant 0 : index
    %58 = vector.load %arg8[%c0_20, %c0_21] : memref<1x128xf32, #tpu.memory_space<vmem>>, vector<1x128xf32>
    %59 = vector.broadcast %58 : vector<1x128xf32> to vector<16x128xf32>
    %60 = arith.addf %57, %59 : vector<16x128xf32>
    %cst_22 = arith.constant 0.000000e+00 : f32
    %61 = vector.broadcast %cst_22 : f32 to vector<16x128xf32>
    %62 = arith.maximumf %60, %61 : vector<16x128xf32>
    %c0_23 = arith.constant 0 : index
    %c0_24 = arith.constant 0 : index
    %c0_25 = arith.constant 0 : index
    %63 = vector.load %arg9[%c0_23, %c0_24, %c0_25] : memref<1x16x128xf32, #tpu.memory_space<vmem>>, vector<1x16x128xf32>
    %64 = vector.shape_cast %63 : vector<1x16x128xf32> to vector<16x128xf32>
    %65 = vector.shape_cast %62 : vector<16x128xf32> to vector<1x16x128xf32>
    tpu.vector_store %arg9[%c0_23, %c0_24, %c0_25], %65 {strides = array<i32>} : memref<1x16x128xf32, #tpu.memory_space<vmem>>, vector<1x16x128xf32>,
    return
  }
  func.func @transform_0(%arg0: i32, %arg1: i32) -> (i32, i32, i32) {
    %c0_i32 = arith.constant 0 : i32
    %c0_i32_0 = arith.constant 0 : i32
    %c0_i32_1 = arith.constant 0 : i32
    return %arg0, %c0_i32, %c0_i32_0 : i32, i32, i32
  }
  func.func @transform_1(%arg0: i32, %arg1: i32) -> (i32, i32) {
    %c0_i32 = arith.constant 0 : i32
    %c0_i32_0 = arith.constant 0 : i32
    %c0_i32_1 = arith.constant 0 : i32
    return %c0_i32, %c0_i32_0 : i32, i32
  }
  func.func @transform_2(%arg0: i32, %arg1: i32) -> (i32, i32) {
    %c0_i32 = arith.constant 0 : i32
    %c0_i32_0 = arith.constant 0 : i32
    %c0_i32_1 = arith.constant 0 : i32
    return %c0_i32, %c0_i32_0 : i32, i32
  }
  func.func @transform_3(%arg0: i32, %arg1: i32) -> (i32, i32) {
    %c0_i32 = arith.constant 0 : i32
    %c0_i32_0 = arith.constant 0 : i32
    %c0_i32_1 = arith.constant 0 : i32
    return %c0_i32, %c0_i32_0 : i32, i32
  }
  func.func @transform_4(%arg0: i32, %arg1: i32) -> (i32, i32) {
    %c0_i32 = arith.constant 0 : i32
    %c0_i32_0 = arith.constant 0 : i32
    %c0_i32_1 = arith.constant 0 : i32
    return %c0_i32, %c0_i32_0 : i32, i32
  }
  func.func @transform_5(%arg0: i32, %arg1: i32) -> (i32, i32) {
    %c0_i32 = arith.constant 0 : i32
    %c0_i32_0 = arith.constant 0 : i32
    %c0_i32_1 = arith.constant 0 : i32
    return %c0_i32, %c0_i32_0 : i32, i32
  }
  func.func @transform_6(%arg0: i32, %arg1: i32) -> (i32, i32) {
    %c0_i32 = arith.constant 0 : i32
    %c0_i32_0 = arith.constant 0 : i32
    %c0_i32_1 = arith.constant 0 : i32
    return %c0_i32, %c0_i32_0 : i32, i32
  }
  func.func @transform_7(%arg0: i32, %arg1: i32) -> (i32, i32, i32) {
    %c0_i32 = arith.constant 0 : i32
    %c0_i32_0 = arith.constant 0 : i32
    return %arg0, %arg1, %c0_i32 : i32, i32, i32
  }
}

</mosaic_0001>

<bundles_post_ra>
// kernel: tile.23
= control target key start
LH: loop header
LB: loop body
LE: loop exit
PB: predicated region body
PF: predicated region fallthrough
CT: control target
= control target key end

     0   :  { %s40_s0 = inlined_call_operand.vmem [shape: f32[4], index: 0, kind: input, shape index: {}]   ;;  %s41_s1 = inlined_call_operand.vmem [shape: f32[32,4], index: 1, kind: output, shape index: {}]  }
   0x1   :  { %v4_v0 = vld [vmem:[%s40_s0] ss:$0 sm:$0xff] }
   0x2   :  { %5 = vst [vmem:[%s41_s1] sm:$0xff] %v4_v0 }
   0x3   :  { %12 = vst [vmem:[%s41_s1 + $0x8] sm:$0xff] %v4_v0 }
   0x4   :  { %13 = vst [vmem:[%s41_s1 + $0x10] sm:$0xff] %v4_v0 }
   0x5   :  { %14 = vst [vmem:[%s41_s1 + $0x18] sm:$0xff] %v4_v0 }

// kernel: tile.24
= control target key start
LH: loop header
LB: loop body
LE: loop exit
PB: predicated region body
PF: predicated region fallthrough
CT: control target
= control target key end

     0   :  { %s259_s10 = smov 124   ;;  %s260_s11 = smov 116   ;;  %vm3_vm0 = vcmask 31744   ;;  %vm9_vm1 = vcmask 1048544   ;;  %vm15_vm2 = vcmask 1015744   ;;  %vm21_vm3 = vcmask 982944   ;;  %s399_s0 = inlined_call_operand.vmem [shape: f32[32,4], index: 0, kind: input, shape index: {}]   ;;  %s400_s1 = inlined_call_operand.vmem [shape: f32[1,128], index: 1, kind: output, shape index: {}]  }
   0x1   :  { %v197_v0 = vld [vmem:[%s399_s0 + $0x1f] sm:$0x1]   ;;  %v199_v1 = vld [vmem:[%s399_s0 + $0x1d] sm:$0x1]   ;;  %v201_v2 = vld [vmem:[%s399_s0 + $0x1b] sm:$0x1]  }
   0x2   :  { %7 = vrot.lane.b32.xlu0 %v197_v0, %s259_s10  ;;  %19 = vrot.lane.b32.xlu1 %v199_v1, %s260_s11  ;;  %s261_s14 = smov 108   ;;  %v198_v3 = vld [vmem:[%s399_s0 + $0x1e] sm:$0x1]   ;;  %v200_v4 = vld [vmem:[%s399_s0 + $0x1c] sm:$0x1]   ;;  %s262_s19 = smov 120  }
   0x3   :  { %31 = vrot.lane.b32.xlu2 %v201_v2, %s261_s14  ;;  %s263_s20 = smov 112   ;;  %v202_v5 = vld [vmem:[%s399_s0 + $0x1a] sm:$0x1]   ;;  %s264_s23 = smov 104   ;;  %v203_v6 = vld [vmem:[%s399_s0 + $0x19] sm:$0x1]  }
   0x4   :  { %v204_v7 = vld [vmem:[%s399_s0 + $0x18] sm:$0x1]   ;;  %s265_s28 = smov 100   ;;  %s266_s29 = smov 96   ;;  %v205_v8 = vld [vmem:[%s399_s0 + $0x17] sm:$0x1]  }
   0x5   :  { %s267_s3 = smov 92   ;;  %v206_v9 = vld [vmem:[%s399_s0 + $0x16] sm:$0x1]   ;;  %v207_v10 = vld [vmem:[%s399_s0 + $0x15] sm:$0x1]   ;;  %s268_s8 = smov 88  }
   0x6   :  { %s269_s9 = smov 84   ;;  %v208_v11 = vld [vmem:[%s399_s0 + $0x14] sm:$0x1]   ;;  %s270_s12 = smov 80   ;;  %v209_v12 = vld [vmem:[%s399_s0 + $0x13] sm:$0x1]  }
   0x7   :  { %v210_v13 = vld [vmem:[%s399_s0 + $0x12] sm:$0x1]   ;;  %s271_s17 = smov 76   ;;  %s272_s18 = smov 72   ;;  %v211_v14 = vld [vmem:[%s399_s0 + $0x11] sm:$0x1]  }
   0x8   :  { %s273_s21 = smov 68   ;;  %v212_v15 = vld [vmem:[%s399_s0 + $0x10] sm:$0x1]   ;;  %v213_v16 = vld [vmem:[%s399_s0 + $0xf] sm:$0x1]   ;;  %s274_s26 = smov 64  }
   0x9   :  { %s275_s27 = smov 60   ;;  %v214_v17 = vld [vmem:[%s399_s0 + $0xe] sm:$0x1]   ;;  %s276_s30 = smov 56   ;;  %v215_v18 = vld [vmem:[%s399_s0 + $0xd] sm:$0x1]  }
   0xa   :  { %13 = vrot.lane.b32.xlu0 %v198_v3, %s262_s19  ;;  %25 = vrot.lane.b32.xlu1 %v200_v4, %s263_s20  ;;  %v216_v19 = vld [vmem:[%s399_s0 + $0xc] sm:$0x1]   ;;  %s277_s6 = smov 52   ;;  %s278_s7 = smov 48   ;;  %v217_v20 = vld [vmem:[%s399_s0 + $0xb] sm:$0x1]  }
   0xb   :  { %37 = vrot.lane.b32.xlu2 %v202_v5, %s264_s23  ;;  %s279_s10 = smov 44   ;;  %v218_v21 = vld [vmem:[%s399_s0 + $0xa] sm:$0x1]   ;;  %v219_v22 = vld [vmem:[%s399_s0 + $0x9] sm:$0x1]   ;;  %s280_s15 = smov 40  }
   0xc   :  { %s281_s16 = smov 36   ;;  %v220_v23 = vld [vmem:[%s399_s0 + $0x8] sm:$0x1]   ;;  %s282_s19 = smov 32   ;;  %v221_v24 = vld [vmem:[%s399_s0 + $0x7] sm:$0x1]  }
   0xd   :  { %v222_v25 = vld [vmem:[%s399_s0 + $0x6] sm:$0x1]   ;;  %s283_s24 = smov 28   ;;  %s284_s25 = smov 24   ;;  %v223_v26 = vld [vmem:[%s399_s0 + $0x5] sm:$0x1]  }
   0xe   :  { %v224_v27 = vld [vmem:[%s399_s0 + $0x4] sm:$0x1]   ;;  %v225_v28 = vld [vmem:[%s399_s0 + $0x3] sm:$0x1]   ;;  %s286_s4 = smov 16   ;;  %s287_s5 = smov 12  }
   0xf   :  { %v226_v29 = vld [vmem:[%s399_s0 + $0x2] sm:$0x1]   ;;  %v227_v30 = vld [vmem:[%s399_s0 + $0x1] sm:$0x1]   ;;  %s289_s11 = smov 4   ;;  %vm27_vm4 = vcmask 950144  }
  0x10   :  { %v2_v31 = vld [vmem:[%s399_s0] sm:$0x1]   ;;  %vm33_vm5 = vcmask 917344   ;;  %vm39_vm6 = vcmask 884544   ;;  %vm45_vm7 = vcmask 851744   ;;  %vm51_vm8 = vcmask 818944  }
  0x11   :  { %4 = vst.msk [vmem:[#allocation0] sm:$0x1] %vm3_vm0, %v2_v31   ;;  %vm57_vm9 = vcmask 786144   ;;  %vm63_vm10 = vcmask 753344   ;;  %vm69_vm11 = vcmask 720544   ;;  %vm75_vm12 = vcmask 687744  }
  0x12   :  { %43 = vrot.lane.b32.xlu0 %v203_v6, %s265_s28  ;;  %49 = vrot.lane.b32.xlu1 %v204_v7, %s266_s29  ;;  %s285_s28 = smov 20   ;;  %vm81_vm13 = vcmask 654944   ;;  %vm87_vm14 = vcmask 622144   ;;  %vm93_vm15 = vcmask 589344   ;;  %vm99_vm0 = vcmask 556544  }
  0x13   :  { %55 = vrot.lane.b32.xlu2 %v205_v8, %s267_s3 }
  0x1a   :  { %61 = vrot.lane.b32.xlu0 %v206_v9, %s268_s8  ;;  %67 = vrot.lane.b32.xlu1 %v207_v10, %s269_s9  ;;  %s288_s8 = smov 8  }
  0x1b   :  { %73 = vrot.lane.b32.xlu2 %v208_v11, %s270_s12 }
  0x22   :  { %79 = vrot.lane.b32.xlu0 %v209_v12, %s271_s17  ;;  %85 = vrot.lane.b32.xlu1 %v210_v13, %s272_s18 }
  0x23   :  { %91 = vrot.lane.b32.xlu2 %v211_v14, %s273_s21 }
  0x2a   :  { %97 = vrot.lane.b32.xlu0 %v212_v15, %s274_s26  ;;  %103 = vrot.lane.b32.xlu1 %v213_v16, %s275_s27 }
  0x2b   :  { %109 = vrot.lane.b32.xlu2 %v214_v17, %s276_s30 }
  0x32   :  { %115 = vrot.lane.b32.xlu0 %v215_v18, %s277_s6  ;;  %121 = vrot.lane.b32.xlu1 %v216_v19, %s278_s7 }
  0x33   :  { %127 = vrot.lane.b32.xlu2 %v217_v20, %s279_s10 }
  0x3a   :  { %133 = vrot.lane.b32.xlu0 %v218_v21, %s280_s15  ;;  %139 = vrot.lane.b32.xlu1 %v219_v22, %s281_s16 }
  0x3b   :  { %145 = vrot.lane.b32.xlu2 %v220_v23, %s282_s19 }
  0x42   :  { %151 = vrot.lane.b32.xlu0 %v221_v24, %s283_s24  ;;  %157 = vrot.lane.b32.xlu1 %v222_v25, %s284_s25 }
  0x43   :  { %163 = vrot.lane.b32.xlu2 %v223_v26, %s285_s28 }
  0x4a   :  { %169 = vrot.lane.b32.xlu0 %v224_v27, %s286_s4  ;;  %175 = vrot.lane.b32.xlu1 %v225_v28, %s287_s5 }
  0x4b   :  { %181 = vrot.lane.b32.xlu2 %v226_v29, %s288_s8 }
  0x52   :  { %187 = vrot.lane.b32.xlu0 %v227_v30, %s289_s11 }
  0x5d   :  { %v32_v32 = vpop.permute.xlu2 %31  }
  0x65   :  { %v38_v33 = vpop.permute.xlu2 %37  }
  0x6d   :  { %v56_v34 = vpop.permute.xlu2 %55  }
  0x74   :  { %v8_v35 = vpop.permute.xlu0 %7   ;;  %v20_v36 = vpop.permute.xlu1 %19  }
  0x75   :  { %10 = vst.msk [vmem:[#allocation0] sm:$0x1] %vm9_vm1, %v8_v35   ;;  %v74_v37 = vpop.permute.xlu2 %73   ;;  %vm105_vm1 = vcmask 523744  }
  0x7c   :  { %v14_v38 = vpop.permute.xlu0 %13   ;;  %v26_v39 = vpop.permute.xlu1 %25  }
  0x7d   :  { %16 = vst.msk [vmem:[#allocation0] sm:$0x1] %vm15_vm2, %v14_v38   ;;  %v92_v40 = vpop.permute.xlu2 %91   ;;  %vm111_vm2 = vcmask 490944  }
  0x7e   :  { %22 = vst.msk [vmem:[#allocation0] sm:$0x1] %vm21_vm3, %v20_v36   ;;  %vm117_vm3 = vcmask 458144  }
  0x7f   :  { %28 = vst.msk [vmem:[#allocation0] sm:$0x1] %vm27_vm4, %v26_v39   ;;  %vm123_vm4 = vcmask 425344  }
  0x80   :  { %34 = vst.msk [vmem:[#allocation0] sm:$0x1] %vm33_vm5, %v32_v32   ;;  %vm129_vm5 = vcmask 392544  }
  0x81   :  { %40 = vst.msk [vmem:[#allocation0] sm:$0x1] %vm39_vm6, %v38_v33   ;;  %vm135_vm6 = vcmask 359744  }
  0x84   :  { %v44_v41 = vpop.permute.xlu0 %43   ;;  %v50_v42 = vpop.permute.xlu1 %49  }
  0x85   :  { %46 = vst.msk [vmem:[#allocation0] sm:$0x1] %vm45_vm7, %v44_v41   ;;  %v110_v43 = vpop.permute.xlu2 %109   ;;  %vm141_vm7 = vcmask 326944  }
  0x86   :  { %52 = vst.msk [vmem:[#allocation0] sm:$0x1] %vm51_vm8, %v50_v42   ;;  %vm147_vm8 = vcmask 294144  }
  0x87   :  { %58 = vst.msk [vmem:[#allocation0] sm:$0x1] %vm57_vm9, %v56_v34   ;;  %vm153_vm9 = vcmask 261344  }
  0x8c   :  { %v62_v44 = vpop.permute.xlu0 %61   ;;  %v68_v45 = vpop.permute.xlu1 %67  }
  0x8d   :  { %64 = vst.msk [vmem:[#allocation0] sm:$0x1] %vm63_vm10, %v62_v44   ;;  %v128_v46 = vpop.permute.xlu2 %127   ;;  %vm159_vm10 = vcmask 228544  }
  0x8e   :  { %70 = vst.msk [vmem:[#allocation0] sm:$0x1] %vm69_vm11, %v68_v45   ;;  %vm165_vm11 = vcmask 195744  }
  0x8f   :  { %76 = vst.msk [vmem:[#allocation0] sm:$0x1] %vm75_vm12, %v74_v37   ;;  %vm171_vm12 = vcmask 162944  }
  0x94   :  { %v80_v47 = vpop.permute.xlu0 %79   ;;  %v86_v48 = vpop.permute.xlu1 %85  }
  0x95   :  { %82 = vst.msk [vmem:[#allocation0] sm:$0x1] %vm81_vm13, %v80_v47   ;;  %v146_v49 = vpop.permute.xlu2 %145   ;;  %vm177_vm13 = vcmask 130144  }
  0x96   :  { %88 = vst.msk [vmem:[#allocation0] sm:$0x1] %vm87_vm14, %v86_v48   ;;  %vm183_vm14 = vcmask 97344  }
  0x97   :  { %94 = vst.msk [vmem:[#allocation0] sm:$0x1] %vm93_vm15, %v92_v40   ;;  %vm189_vm15 = vcmask 64544  }
  0x9c   :  { %v98_v50 = vpop.permute.xlu0 %97   ;;  %v104_v51 = vpop.permute.xlu1 %103  }
  0x9d   :  { %100 = vst.msk [vmem:[#allocation0] sm:$0x1] %vm99_vm0, %v98_v50   ;;  %v164_v52 = vpop.permute.xlu2 %163  }
  0x9e   :  { %106 = vst.msk [vmem:[#allocation0] sm:$0x1] %vm105_vm1, %v104_v51  }
  0x9f   :  { %112 = vst.msk [vmem:[#allocation0] sm:$0x1] %vm111_vm2, %v110_v43  }
  0xa4   :  { %v116_v53 = vpop.permute.xlu0 %115   ;;  %v122_v54 = vpop.permute.xlu1 %121  }
  0xa5   :  { %118 = vst.msk [vmem:[#allocation0] sm:$0x1] %vm117_vm3, %v116_v53   ;;  %v182_v55 = vpop.permute.xlu2 %181  }
  0xa6   :  { %124 = vst.msk [vmem:[#allocation0] sm:$0x1] %vm123_vm4, %v122_v54  }
  0xa7   :  { %130 = vst.msk [vmem:[#allocation0] sm:$0x1] %vm129_vm5, %v128_v46  }
  0xac   :  { %v134_v56 = vpop.permute.xlu0 %133   ;;  %v140_v57 = vpop.permute.xlu1 %139  }
  0xad   :  { %136 = vst.msk [vmem:[#allocation0] sm:$0x1] %vm135_vm6, %v134_v56  }
  0xae   :  { %142 = vst.msk [vmem:[#allocation0] sm:$0x1] %vm141_vm7, %v140_v57  }
  0xaf   :  { %148 = vst.msk [vmem:[#allocation0] sm:$0x1] %vm147_vm8, %v146_v49  }
  0xb4   :  { %v152_v58 = vpop.permute.xlu0 %151   ;;  %v158_v59 = vpop.permute.xlu1 %157  }
  0xb5   :  { %154 = vst.msk [vmem:[#allocation0] sm:$0x1] %vm153_vm9, %v152_v58  }
  0xb6   :  { %160 = vst.msk [vmem:[#allocation0] sm:$0x1] %vm159_vm10, %v158_v59  }
  0xb7   :  { %166 = vst.msk [vmem:[#allocation0] sm:$0x1] %vm165_vm11, %v164_v52  }
  0xbc   :  { %v170_v60 = vpop.permute.xlu0 %169   ;;  %v176_v61 = vpop.permute.xlu1 %175  }
  0xbd   :  { %172 = vst.msk [vmem:[#allocation0] sm:$0x1] %vm171_vm12, %v170_v60  }
  0xbe   :  { %178 = vst.msk [vmem:[#allocation0] sm:$0x1] %vm177_vm13, %v176_v61  }
  0xbf   :  { %184 = vst.msk [vmem:[#allocation0] sm:$0x1] %vm183_vm14, %v182_v55  }
  0xc4   :  { %v188_v62 = vpop.permute.xlu0 %187  }
  0xc5   :  { %190 = vst.msk [vmem:[#allocation0] sm:$0x1] %vm189_vm15, %v188_v62  }
  0xcc   :  { %v193_v63 = vld [vmem:[#allocation0] sm:$0x1] }
  0xcd   :  { %196 = vst [vmem:[%s400_s1] sm:$0x1] %v193_v63 }

// kernel: tile.18
= control target key start
LH: loop header
LB: loop body
LE: loop exit
PB: predicated region body
PF: predicated region fallthrough
CT: control target
= control target key end

     0   :  { %s64_s0 = inlined_call_operand.vmem [shape: f32[4], index: 0, kind: input, shape index: {}]   ;;  %s65_s1 = inlined_call_operand.vmem [shape: f32[64,4], index: 1, kind: output, shape index: {}]  }
   0x1   :  { %v4_v0 = vld [vmem:[%s64_s0] ss:$0 sm:$0xff] }
   0x2   :  { %5 = vst [vmem:[%s65_s1] sm:$0xff] %v4_v0 }
   0x3   :  { %20 = vst [vmem:[%s65_s1 + $0x8] sm:$0xff] %v4_v0 }
   0x4   :  { %21 = vst [vmem:[%s65_s1 + $0x10] sm:$0xff] %v4_v0 }
   0x5   :  { %22 = vst [vmem:[%s65_s1 + $0x18] sm:$0xff] %v4_v0 }
   0x6   :  { %23 = vst [vmem:[%s65_s1 + $0x20] sm:$0xff] %v4_v0 }
   0x7   :  { %24 = vst [vmem:[%s65_s1 + $0x28] sm:$0xff] %v4_v0 }
   0x8   :  { %25 = vst [vmem:[%s65_s1 + $0x30] sm:$0xff] %v4_v0 }
   0x9   :  { %26 = vst [vmem:[%s65_s1 + $0x38] sm:$0xff] %v4_v0 }

// kernel: tile.19
= control target key start
LH: loop header
LB: loop body
LE: loop exit
PB: predicated region body
PF: predicated region fallthrough
CT: control target
= control target key end

     0   :  { %vm5_vm0 = vcmask 1041409   ;;  %s426_s14 = smov 124   ;;  %s427_s15 = smov 116   ;;  %vm7_vm1 = vcmask 31744   ;;  %vm17_vm2 = vcmask 1048544   ;;  %vm27_vm3 = vcmask 1015744   ;;  %s697_s0 = inlined_call_operand.vmem [shape: f32[64,4], index: 0, kind: input, shape index: {}]   ;;  %s698_s1 = inlined_call_operand.vmem [shape: f32[1,256], index: 1, kind: output, shape index: {}]  }
   0x1   :  { %v332_v0 = vld [vmem:[%s697_s0 + $0x1f] sm:$0x1]   ;;  %v336_v3 = vld [vmem:[%s697_s0 + $0x1d] sm:$0x1]   ;;  %v334_v6 = vld [vmem:[%s697_s0 + $0x1e] sm:$0x1]  }
   0x2   :  { %v333_v1 = vld [vmem:[%s697_s0 + $0x3e] sm:$0x2]   ;;  %v337_v4 = vld [vmem:[%s697_s0 + $0x3c] sm:$0x2]   ;;  %v335_v7 = vld [vmem:[%s697_s0 + $0x3d] sm:$0x2]  }
   0x3   :  { %v14_v2 = vsel %vm5_vm0, %v333_v1, %v332_v0  ;;  %v34_v5 = vsel %vm5_vm0, %v337_v4, %v336_v3  ;;  %v338_v8 = vld [vmem:[%s697_s0 + $0x1c] sm:$0x1]   ;;  %v24_v10 = vsel %vm5_vm0, %v335_v7, %v334_v6  ;;  %v340_v11 = vld [vmem:[%s697_s0 + $0x1b] sm:$0x1]   ;;  %s428_s28 = smov 108   ;;  %s429_s29 = smov 120  }
   0x4   :  { %15 = vrot.lane.b32.xlu0 %v14_v2, %s426_s14  ;;  %35 = vrot.lane.b32.xlu1 %v34_v5, %s427_s15  ;;  %v339_v9 = vld [vmem:[%s697_s0 + $0x3b] sm:$0x2]   ;;  %v341_v12 = vld [vmem:[%s697_s0 + $0x3a] sm:$0x2]   ;;  %s430_s30 = smov 112   ;;  %s431_s14 = smov 104  }
   0x5   :  { %v44_v13 = vsel %vm5_vm0, %v339_v9, %v338_v8  ;;  %v54_v14 = vsel %vm5_vm0, %v341_v12, %v340_v11  ;;  %v342_v15 = vld [vmem:[%s697_s0 + $0x1a] sm:$0x1]   ;;  %v344_v17 = vld [vmem:[%s697_s0 + $0x19] sm:$0x1]   ;;  %v346_v19 = vld [vmem:[%s697_s0 + $0x18] sm:$0x1]  }
   0x6   :  { %55 = vrot.lane.b32.xlu2 %v54_v14, %s428_s28  ;;  %v343_v16 = vld [vmem:[%s697_s0 + $0x39] sm:$0x2]   ;;  %v345_v18 = vld [vmem:[%s697_s0 + $0x38] sm:$0x2]   ;;  %v347_v20 = vld [vmem:[%s697_s0 + $0x37] sm:$0x2]  }
   0x7   :  { %v64_v21 = vsel %vm5_vm0, %v343_v16, %v342_v15  ;;  %v74_v22 = vsel %vm5_vm0, %v345_v18, %v344_v17  ;;  %v84_v23 = vsel %vm5_vm0, %v347_v20, %v346_v19  ;;  %s432_s15 = smov 100   ;;  %s433_s16 = smov 96   ;;  %v348_v24 = vld [vmem:[%s697_s0 + $0x17] sm:$0x1]   ;;  %v350_v26 = vld [vmem:[%s697_s0 + $0x16] sm:$0x1]  }
   0x8   :  { %v349_v25 = vld [vmem:[%s697_s0 + $0x36] sm:$0x2]   ;;  %v351_v27 = vld [vmem:[%s697_s0 + $0x35] sm:$0x2]   ;;  %v352_v28 = vld [vmem:[%s697_s0 + $0x15] sm:$0x1]  }
   0x9   :  { %v353_v29 = vld [vmem:[%s697_s0 + $0x34] sm:$0x2]   ;;  %v94_v30 = vsel %vm5_vm0, %v349_v25, %v348_v24  ;;  %v104_v31 = vsel %vm5_vm0, %v351_v27, %v350_v26  ;;  %s436_s2 = smov 84   ;;  %v354_v33 = vld [vmem:[%s697_s0 + $0x14] sm:$0x1]   ;;  %s439_s17 = smov 72  }
   0xa   :  { %v114_v32 = vsel %vm5_vm0, %v353_v29, %v352_v28  ;;  %v355_v34 = vld [vmem:[%s697_s0 + $0x33] sm:$0x2]   ;;  %v356_v35 = vld [vmem:[%s697_s0 + $0x13] sm:$0x1]   ;;  %v358_v37 = vld [vmem:[%s697_s0 + $0x12] sm:$0x1]  }
   0xb   :  { %v357_v36 = vld [vmem:[%s697_s0 + $0x32] sm:$0x2]   ;;  %v359_v38 = vld [vmem:[%s697_s0 + $0x31] sm:$0x2]   ;;  %v124_v39 = vsel %vm5_vm0, %v355_v34, %v354_v33  ;;  %v360_v42 = vld [vmem:[%s697_s0 + $0x11] sm:$0x1]  }
   0xc   :  { %25 = vrot.lane.b32.xlu0 %v24_v10, %s429_s29  ;;  %45 = vrot.lane.b32.xlu1 %v44_v13, %s430_s30  ;;  %s434_s29 = smov 92   ;;  %s435_s30 = smov 88   ;;  %v134_v40 = vsel %vm5_vm0, %v357_v36, %v356_v35  ;;  %v144_v41 = vsel %vm5_vm0, %v359_v38, %v358_v37  ;;  %v361_v43 = vld [vmem:[%s697_s0 + $0x30] sm:$0x2]   ;;  %v362_v44 = vld [vmem:[%s697_s0 + $0x10] sm:$0x1]  }
   0xd   :  { %v363_v45 = vld [vmem:[%s697_s0 + $0x2f] sm:$0x2]   ;;  %v364_v46 = vld [vmem:[%s697_s0 + $0xf] sm:$0x1]   ;;  %v154_v48 = vsel %vm5_vm0, %v361_v43, %v360_v42  ;;  %s442_s3 = smov 60   ;;  %s445_s18 = smov 48  }
   0xe   :  { %65 = vrot.lane.b32.xlu2 %v64_v21, %s431_s14  ;;  %v365_v47 = vld [vmem:[%s697_s0 + $0x2e] sm:$0x2]   ;;  %v164_v49 = vsel %vm5_vm0, %v363_v45, %v362_v44  ;;  %v366_v51 = vld [vmem:[%s697_s0 + $0xe] sm:$0x1]   ;;  %v368_v53 = vld [vmem:[%s697_s0 + $0xd] sm:$0x1]  }
   0xf   :  { %v174_v50 = vsel %vm5_vm0, %v365_v47, %v364_v46  ;;  %v367_v52 = vld [vmem:[%s697_s0 + $0x2d] sm:$0x2]   ;;  %v369_v54 = vld [vmem:[%s697_s0 + $0x2c] sm:$0x2]   ;;  %v370_v55 = vld [vmem:[%s697_s0 + $0xc] sm:$0x1]  }
  0x10   :  { %v371_v56 = vld [vmem:[%s697_s0 + $0x2b] sm:$0x2]   ;;  %v184_v57 = vsel %vm5_vm0, %v367_v52, %v366_v51  ;;  %v194_v58 = vsel %vm5_vm0, %v369_v54, %v368_v53  ;;  %v372_v60 = vld [vmem:[%s697_s0 + $0xb] sm:$0x1]   ;;  %v374_v62 = vld [vmem:[%s697_s0 + $0xa] sm:$0x1]  }
  0x11   :  { %v204_v59 = vsel %vm5_vm0, %v371_v56, %v370_v55  ;;  %v373_v61 = vld [vmem:[%s697_s0 + $0x2a] sm:$0x2]   ;;  %v375_v63 = vld [vmem:[%s697_s0 + $0x29] sm:$0x2]   ;;  %v376_v0 = vld [vmem:[%s697_s0 + $0x9] sm:$0x1]  }
  0x12   :  { %v377_v1 = vld [vmem:[%s697_s0 + $0x28] sm:$0x2]   ;;  %v214_v2 = vsel %vm5_vm0, %v373_v61, %v372_v60  ;;  %v224_v3 = vsel %vm5_vm0, %v375_v63, %v374_v62  ;;  %s448_s4 = smov 36   ;;  %v378_v5 = vld [vmem:[%s697_s0 + $0x8] sm:$0x1]   ;;  %s451_s19 = smov 24  }
  0x13   :  { %v234_v4 = vsel %vm5_vm0, %v377_v1, %v376_v0  ;;  %v379_v6 = vld [vmem:[%s697_s0 + $0x27] sm:$0x2]   ;;  %v380_v7 = vld [vmem:[%s697_s0 + $0x7] sm:$0x1]   ;;  %v382_v9 = vld [vmem:[%s697_s0 + $0x6] sm:$0x1]  }
  0x14   :  { %75 = vrot.lane.b32.xlu0 %v74_v22, %s432_s15  ;;  %85 = vrot.lane.b32.xlu1 %v84_v23, %s433_s16  ;;  %s437_s15 = smov 80   ;;  %s438_s16 = smov 76   ;;  %v381_v8 = vld [vmem:[%s697_s0 + $0x26] sm:$0x2]   ;;  %v383_v10 = vld [vmem:[%s697_s0 + $0x25] sm:$0x2]   ;;  %v244_v11 = vsel %vm5_vm0, %v379_v6, %v378_v5 }
  0x15   :  { %v254_v12 = vsel %vm5_vm0, %v381_v8, %v380_v7  ;;  %v264_v13 = vsel %vm5_vm0, %v383_v10, %v382_v9  ;;  %v384_v14 = vld [vmem:[%s697_s0 + $0x5] sm:$0x1]   ;;  %v386_v16 = vld [vmem:[%s697_s0 + $0x4] sm:$0x1]   ;;  %v388_v18 = vld [vmem:[%s697_s0 + $0x3] sm:$0x1]  }
  0x16   :  { %95 = vrot.lane.b32.xlu2 %v94_v30, %s434_s29  ;;  %v385_v15 = vld [vmem:[%s697_s0 + $0x24] sm:$0x2]   ;;  %v387_v17 = vld [vmem:[%s697_s0 + $0x23] sm:$0x2]   ;;  %v389_v19 = vld [vmem:[%s697_s0 + $0x22] sm:$0x2]  }
  0x17   :  { %v274_v20 = vsel %vm5_vm0, %v385_v15, %v384_v14  ;;  %v284_v21 = vsel %vm5_vm0, %v387_v17, %v386_v16  ;;  %v294_v22 = vsel %vm5_vm0, %v389_v19, %v388_v18  ;;  %s454_s5 = smov 12   ;;  %v390_v23 = vld [vmem:[%s697_s0 + $0x2] sm:$0x1]   ;;  %v392_v25 = vld [vmem:[%s697_s0 + $0x1] sm:$0x1]   ;;  %s455_s14 = smov 8  }
  0x18   :  { %v391_v24 = vld [vmem:[%s697_s0 + $0x21] sm:$0x2]   ;;  %v393_v26 = vld [vmem:[%s697_s0 + $0x20] sm:$0x2]   ;;  %v2_v29 = vld [vmem:[%s697_s0] sm:$0x1]  }
  0x19   :  { %v304_v27 = vsel %vm5_vm0, %v391_v24, %v390_v23  ;;  %v314_v28 = vsel %vm5_vm0, %v393_v26, %v392_v25  ;;  %v331_v30 = vld [vmem:[%s697_s0 + $0x1f] sm:$0x2]   ;;  %vm37_vm4 = vcmask 982944   ;;  %vm47_vm5 = vcmask 950144  }
  0x1a   :  { %vm57_vm6 = vcmask 917344   ;;  %vm67_vm7 = vcmask 884544   ;;  %vm77_vm8 = vcmask 851744   ;;  %vm87_vm9 = vcmask 818944  }
  0x1b   :  { %vm97_vm10 = vcmask 786144   ;;  %vm107_vm11 = vcmask 753344   ;;  %vm117_vm12 = vcmask 720544   ;;  %vm127_vm13 = vcmask 687744  }
  0x1c   :  { %105 = vrot.lane.b32.xlu0 %v104_v31, %s435_s30  ;;  %115 = vrot.lane.b32.xlu1 %v114_v32, %s436_s2  ;;  %s440_s30 = smov 68   ;;  %s441_s2 = smov 64   ;;  %v6_v31 = vsel %vm5_vm0, %v331_v30, %v2_v29  ;;  %vm137_vm14 = vcmask 654944   ;;  %vm147_vm15 = vcmask 622144   ;;  %vm157_vm0 = vcmask 589344  }
  0x1d   :  { %8 = vst.msk [vmem:[#allocation0] ss:$8 sm:$0x3] %vm7_vm1, %v6_v31   ;;  %vm167_vm1 = vcmask 556544  }
  0x1e   :  { %125 = vrot.lane.b32.xlu2 %v124_v39, %s437_s15  ;;  %s456_s15 = smov 4  }
  0x24   :  { %135 = vrot.lane.b32.xlu0 %v134_v40, %s438_s16  ;;  %145 = vrot.lane.b32.xlu1 %v144_v41, %s439_s17  ;;  %s443_s16 = smov 56   ;;  %s444_s17 = smov 52  }
  0x26   :  { %155 = vrot.lane.b32.xlu2 %v154_v48, %s440_s30 }
  0x2c   :  { %165 = vrot.lane.b32.xlu0 %v164_v49, %s441_s2  ;;  %175 = vrot.lane.b32.xlu1 %v174_v50, %s442_s3  ;;  %s446_s2 = smov 44   ;;  %s447_s3 = smov 40  }
  0x2e   :  { %185 = vrot.lane.b32.xlu2 %v184_v57, %s443_s16 }
  0x34   :  { %195 = vrot.lane.b32.xlu0 %v194_v58, %s444_s17  ;;  %205 = vrot.lane.b32.xlu1 %v204_v59, %s445_s18  ;;  %s449_s17 = smov 32   ;;  %s450_s18 = smov 28  }
  0x36   :  { %215 = vrot.lane.b32.xlu2 %v214_v2, %s446_s2 }
  0x3c   :  { %225 = vrot.lane.b32.xlu0 %v224_v3, %s447_s3  ;;  %235 = vrot.lane.b32.xlu1 %v234_v4, %s448_s4  ;;  %s452_s3 = smov 20   ;;  %s453_s4 = smov 16  }
  0x3e   :  { %245 = vrot.lane.b32.xlu2 %v244_v11, %s449_s17 }
  0x44   :  { %255 = vrot.lane.b32.xlu0 %v254_v12, %s450_s18  ;;  %265 = vrot.lane.b32.xlu1 %v264_v13, %s451_s19 }
  0x46   :  { %275 = vrot.lane.b32.xlu2 %v274_v20, %s452_s3 }
  0x4c   :  { %285 = vrot.lane.b32.xlu0 %v284_v21, %s453_s4  ;;  %295 = vrot.lane.b32.xlu1 %v294_v22, %s454_s5 }
  0x4e   :  { %305 = vrot.lane.b32.xlu2 %v304_v27, %s455_s14 }
  0x54   :  { %315 = vrot.lane.b32.xlu0 %v314_v28, %s456_s15 }
  0x60   :  { %v56_v32 = vpop.permute.xlu2 %55  }
  0x68   :  { %v66_v33 = vpop.permute.xlu2 %65  }
  0x70   :  { %v96_v34 = vpop.permute.xlu2 %95  }
  0x76   :  { %v16_v35 = vpop.permute.xlu0 %15   ;;  %v36_v36 = vpop.permute.xlu1 %35  }
  0x77   :  { %18 = vst.msk [vmem:[#allocation0] ss:$8 sm:$0x3] %vm17_vm2, %v16_v35   ;;  %vm177_vm2 = vcmask 523744  }
  0x78   :  { %v126_v37 = vpop.permute.xlu2 %125  }
  0x7e   :  { %v26_v38 = vpop.permute.xlu0 %25   ;;  %v46_v39 = vpop.permute.xlu1 %45  }
  0x7f   :  { %28 = vst.msk [vmem:[#allocation0] ss:$8 sm:$0x3] %vm27_vm3, %v26_v38   ;;  %vm187_vm3 = vcmask 490944  }
  0x80   :  { %38 = vst.msk [vmem:[#allocation0] ss:$8 sm:$0x3] %vm37_vm4, %v36_v36   ;;  %v156_v40 = vpop.permute.xlu2 %155   ;;  %vm197_vm4 = vcmask 458144  }
  0x81   :  { %48 = vst.msk [vmem:[#allocation0] ss:$8 sm:$0x3] %vm47_vm5, %v46_v39   ;;  %vm207_vm5 = vcmask 425344  }
  0x82   :  { %58 = vst.msk [vmem:[#allocation0] ss:$8 sm:$0x3] %vm57_vm6, %v56_v32   ;;  %vm217_vm6 = vcmask 392544  }
  0x83   :  { %68 = vst.msk [vmem:[#allocation0] ss:$8 sm:$0x3] %vm67_vm7, %v66_v33   ;;  %vm227_vm7 = vcmask 359744  }
  0x86   :  { %v76_v41 = vpop.permute.xlu0 %75   ;;  %v86_v42 = vpop.permute.xlu1 %85  }
  0x87   :  { %78 = vst.msk [vmem:[#allocation0] ss:$8 sm:$0x3] %vm77_vm8, %v76_v41   ;;  %vm237_vm8 = vcmask 326944  }
  0x88   :  { %88 = vst.msk [vmem:[#allocation0] ss:$8 sm:$0x3] %vm87_vm9, %v86_v42   ;;  %v186_v43 = vpop.permute.xlu2 %185   ;;  %vm247_vm9 = vcmask 294144  }
  0x89   :  { %98 = vst.msk [vmem:[#allocation0] ss:$8 sm:$0x3] %vm97_vm10, %v96_v34   ;;  %vm257_vm10 = vcmask 261344  }
  0x8e   :  { %v106_v44 = vpop.permute.xlu0 %105   ;;  %v116_v45 = vpop.permute.xlu1 %115  }
  0x8f   :  { %108 = vst.msk [vmem:[#allocation0] ss:$8 sm:$0x3] %vm107_vm11, %v106_v44   ;;  %vm267_vm11 = vcmask 228544  }
  0x90   :  { %118 = vst.msk [vmem:[#allocation0] ss:$8 sm:$0x3] %vm117_vm12, %v116_v45   ;;  %v216_v46 = vpop.permute.xlu2 %215   ;;  %vm277_vm12 = vcmask 195744  }
  0x91   :  { %128 = vst.msk [vmem:[#allocation0] ss:$8 sm:$0x3] %vm127_vm13, %v126_v37   ;;  %vm287_vm13 = vcmask 162944  }
  0x96   :  { %v136_v47 = vpop.permute.xlu0 %135   ;;  %v146_v48 = vpop.permute.xlu1 %145  }
  0x97   :  { %138 = vst.msk [vmem:[#allocation0] ss:$8 sm:$0x3] %vm137_vm14, %v136_v47   ;;  %vm297_vm14 = vcmask 130144  }
  0x98   :  { %148 = vst.msk [vmem:[#allocation0] ss:$8 sm:$0x3] %vm147_vm15, %v146_v48   ;;  %v246_v49 = vpop.permute.xlu2 %245   ;;  %vm307_vm15 = vcmask 97344  }
  0x99   :  { %158 = vst.msk [vmem:[#allocation0] ss:$8 sm:$0x3] %vm157_vm0, %v156_v40   ;;  %vm317_vm0 = vcmask 64544  }
  0x9e   :  { %v166_v50 = vpop.permute.xlu0 %165   ;;  %v176_v51 = vpop.permute.xlu1 %175  }
  0x9f   :  { %168 = vst.msk [vmem:[#allocation0] ss:$8 sm:$0x3] %vm167_vm1, %v166_v50  }
  0xa0   :  { %178 = vst.msk [vmem:[#allocation0] ss:$8 sm:$0x3] %vm177_vm2, %v176_v51   ;;  %v276_v52 = vpop.permute.xlu2 %275  }
  0xa1   :  { %188 = vst.msk [vmem:[#allocation0] ss:$8 sm:$0x3] %vm187_vm3, %v186_v43  }
  0xa6   :  { %v196_v53 = vpop.permute.xlu0 %195   ;;  %v206_v54 = vpop.permute.xlu1 %205  }
  0xa7   :  { %198 = vst.msk [vmem:[#allocation0] ss:$8 sm:$0x3] %vm197_vm4, %v196_v53  }
  0xa8   :  { %208 = vst.msk [vmem:[#allocation0] ss:$8 sm:$0x3] %vm207_vm5, %v206_v54   ;;  %v306_v55 = vpop.permute.xlu2 %305  }
  0xa9   :  { %218 = vst.msk [vmem:[#allocation0] ss:$8 sm:$0x3] %vm217_vm6, %v216_v46  }
  0xae   :  { %v226_v56 = vpop.permute.xlu0 %225   ;;  %v236_v57 = vpop.permute.xlu1 %235  }
  0xaf   :  { %228 = vst.msk [vmem:[#allocation0] ss:$8 sm:$0x3] %vm227_vm7, %v226_v56  }
  0xb0   :  { %238 = vst.msk [vmem:[#allocation0] ss:$8 sm:$0x3] %vm237_vm8, %v236_v57  }
  0xb1   :  { %248 = vst.msk [vmem:[#allocation0] ss:$8 sm:$0x3] %vm247_vm9, %v246_v49  }
  0xb6   :  { %v256_v58 = vpop.permute.xlu0 %255   ;;  %v266_v59 = vpop.permute.xlu1 %265  }
  0xb7   :  { %258 = vst.msk [vmem:[#allocation0] ss:$8 sm:$0x3] %vm257_vm10, %v256_v58  }
  0xb8   :  { %268 = vst.msk [vmem:[#allocation0] ss:$8 sm:$0x3] %vm267_vm11, %v266_v59  }
  0xb9   :  { %278 = vst.msk [vmem:[#allocation0] ss:$8 sm:$0x3] %vm277_vm12, %v276_v52  }
  0xbe   :  { %v286_v60 = vpop.permute.xlu0 %285   ;;  %v296_v61 = vpop.permute.xlu1 %295  }
  0xbf   :  { %288 = vst.msk [vmem:[#allocation0] ss:$8 sm:$0x3] %vm287_vm13, %v286_v60  }
  0xc0   :  { %298 = vst.msk [vmem:[#allocation0] ss:$8 sm:$0x3] %vm297_vm14, %v296_v61  }
  0xc1   :  { %308 = vst.msk [vmem:[#allocation0] ss:$8 sm:$0x3] %vm307_vm15, %v306_v55  }
  0xc6   :  { %v316_v62 = vpop.permute.xlu0 %315  }
  0xc7   :  { %318 = vst.msk [vmem:[#allocation0] ss:$8 sm:$0x3] %vm317_vm0, %v316_v62  }
  0xce   :  { %v321_v63 = vld [vmem:[#allocation0] sm:$0x1]  ;;  %v326_v0 = vld [vmem:[#allocation0 + $0x8] sm:$0x1] }
  0xcf   :  { %324 = vst [vmem:[%s698_s1] sm:$0x1] %v321_v63 }
  0xd0   :  { %394 = vst [vmem:[%s698_s1 + $0x1] sm:$0x1] %v326_v0 }

// kernel: up_forward.1
= control target key start
LH: loop header
LB: loop body
LE: loop exit
PB: predicated region body
PF: predicated region fallthrough
CT: control target
= control target key end

     0   :  { %s1634_s24 = smov 0   ;;  %s1636_s25 = smov 0   ;;  %s1972_s0 = inlined_call_operand.vmem [shape: bf16[2,18,128], index: 0, kind: input, shape index: {}]   ;;  %s1973_s1 = inlined_call_operand.vmem [shape: bf16[128,256], index: 1, kind: input, shape index: {}]   ;;  %s1974_s2 = inlined_call_operand.vmem [shape: f32[1,256], index: 2, kind: input, shape index: {}]   ;;  %s1975_s3 = inlined_call_operand.vmem [shape: bf16[384,128], index: 3, kind: input, shape index: {}]   ;;  %s1976_s4 = inlined_call_operand.vmem [shape: f32[1,128], index: 4, kind: input, shape index: {}]   ;;  %s1977_s5 = inlined_call_operand.vmem [shape: bf16[384,128], index: 5, kind: input, shape index: {}]   ;;  %s1978_s6 = inlined_call_operand.vmem [shape: f32[1,128], index: 6, kind: input, shape index: {}]   ;;  %s1979_s7 = inlined_call_operand.vmem [shape: f32[2,32,128], index: 7, kind: output, shape index: {}]  }
   0x1   :  { %s1638_s26 = smov 0   ;;  %s1640_s27 = smov 0  }
   0x2   :  { %s1642_s28 = smov 0  }
   0x3 LB: > { %s26_s29 = sadd.s32 1, %s1583_s26  ;;  %s29_s30 = sadd.s32 1, %s1587_s27  ;;  %s1591_s28 = sphi %s1642_s28, %s17_s28   ;;  %s1587_s27 = sphi %s1640_s27, %s1983_s27   ;;  %s1583_s26 = sphi %s1638_s26, %s1982_s26   ;;  %s1579_s25 = sphi %s1636_s25, %s1981_s25   ;;  %s1575_s24 = sphi %s1634_s24, %s1980_s24  }
   0x4   : > { %p27_p0 = scmp.ge.s32.totalorder %s26_s29, 2  ;;  %p1173_p1 = scmp.ge.s32.totalorder %s1591_s28, 1 }
   0x5   : > { %p251_p2 = scmp.lt.s32.totalorder %s1591_s28, 5 }
   0x6   : > { %s1985_s29 = smov (%p27_p0, %s26_s29), 0  ;;  %s1987_s30 = smov (!%p27_p0, %s29_s30), %s1587_s27 }
   0x7   : > { %p252_p3 = pnand %p1173_p1, %p251_p2  ;;  %p31_p4 = scmp.ge.s32.totalorder %s1987_s30, 2 }
   0x8   : > { %p287_p5 = scmp.lt.s32.totalorder (!%p252_p3), %s1579_s25, 1  ;;  %s1178_s22 = sshll.u32 (!%p252_p3), %s1575_s24, 3 }
   0x9   : > { %s1989_s30 = smov (%p31_p4, %s1987_s30), 0  ;;  %255 = sbr.rel (%p252_p3) target bundleno = 515 (0x203), region = 48 }
   0xa   : > { %s303_s18 = sshra.s32 (!%p252_p3), %s1178_s22, 3  ;;  %s1248_s12 = sshll.u32 (!%p252_p3), %s1575_s24, 4 }
   0xb   : > { %s1179_s14 = sshll.u32 (!%p252_p3), %s303_s18, 2  ;;  %s1249_s19 = sadd.s32 (!%p252_p3), 4294967294, %s1248_s12 }
   0xe   : > { %v1242_v0 = vld [vmem:[%s1973_s1 + $0x70] sm:$0xf]  ;;  %v1460_v1 = vld [vmem:[%s1973_s1 + $0x74] sm:$0xf0]  ;;  %v1459_v2 = vld [vmem:[%s1973_s1 + $0x74] sm:$0xf] }
   0xf   : > { %v1243_v3 = vor.u32 %v1460_v1, %v1242_v0  ;;  %v1244_v4 = vld [vmem:[%s1973_s1 + $0x78] sm:$0xf0]  ;;  %v1234_v5 = vld [vmem:[%s1973_s1 + $0x60] sm:$0xf]  ;;  %v1458_v6 = vld [vmem:[%s1973_s1 + $0x64] sm:$0xf0] }
  0x10   : > { %v1247_v7 = vor.u32 %v1459_v2, %v1244_v4  ;;  %v1457_v8 = vld [vmem:[%s1973_s1 + $0x64] sm:$0xf]  ;;  %v1236_v9 = vld [vmem:[%s1973_s1 + $0x68] sm:$0xf0]  ;;  %v1235_v10 = vor.u32 %v1458_v6, %v1234_v5  ;;  %v1226_v12 = vld [vmem:[%s1973_s1 + $0x50] sm:$0xf] }
  0x11   : > { %417 = vmatpush.bf16.msra.mxu0 %v1243_v3  ;;  %v1239_v11 = vor.u32 %v1457_v8, %v1236_v9  ;;  %v1456_v13 = vld [vmem:[%s1973_s1 + $0x54] sm:$0xf0]  ;;  %v1455_v14 = vld [vmem:[%s1973_s1 + $0x54] sm:$0xf]  ;;  %v1228_v15 = vld [vmem:[%s1973_s1 + $0x58] sm:$0xf0]  ;;  %v473_v9 = vlaneseq }
  0x12   : > { %431 = vmatpush.bf16.msra.mxu1 %v1247_v7  ;;  %v1227_v16 = vor.u32 %v1456_v13, %v1226_v12  ;;  %v1231_v17 = vor.u32 %v1455_v14, %v1228_v15  ;;  %v1218_v18 = vld [vmem:[%s1973_s1 + $0x40] sm:$0xf]  ;;  %v1454_v19 = vld [vmem:[%s1973_s1 + $0x44] sm:$0xf0]  ;;  %v1453_v20 = vld [vmem:[%s1973_s1 + $0x44] sm:$0xf]  ;;  %v477_v14 = vstv %s1249_s19 }
  0x13   : > { %v1220_v21 = vld [vmem:[%s1973_s1 + $0x48] sm:$0xf0]  ;;  %v1219_v22 = vor.u32 %v1454_v19, %v1218_v18  ;;  %v1210_v23 = vld [vmem:[%s1973_s1 + $0x30] sm:$0xf]  ;;  %v1468_v24 = vld [vmem:[%s1975_s3 + $0x38] sm:$0xff]  ;;  %s1991_s25 = smov (!%p287_p5, %s1579_s25), 1 }
  0x14   : > { %v1223_v25 = vor.u32 %v1453_v20, %v1220_v21  ;;  %v1452_v26 = vld [vmem:[%s1973_s1 + $0x34] sm:$0xf0]  ;;  %v1451_v27 = vld [vmem:[%s1973_s1 + $0x34] sm:$0xf]  ;;  %v1212_v29 = vld [vmem:[%s1973_s1 + $0x38] sm:$0xf0]  ;;  %732 = vmatpush.bf16.msra.mxu2 %v1468_v24 }
  0x15   : > { %418 = vmatpush.bf16.msra.mxu0 %v1235_v10  ;;  %v1476_v28 = vld [vmem:[%s1975_s3 + $0x78] sm:$0xff]  ;;  %v1467_v30 = vld [vmem:[%s1975_s3 + $0x30] sm:$0xff]  ;;  %v1211_v31 = vor.u32 %v1452_v26, %v1210_v23  ;;  %v1215_v32 = vor.u32 %v1451_v27, %v1212_v29  ;;  %v1202_v33 = vld [vmem:[%s1973_s1 + $0x20] sm:$0xf]  ;;  %s1509_s15 = smul.u32 12, %s1991_s25  ;;  %v1848_v12 = vshrl.u32 %v473_v9, 7 }
  0x16   : > { %432 = vmatpush.bf16.msra.mxu1 %v1239_v11  ;;  %750 = vmatpush.bf16.msra.mxu3 %v1476_v28  ;;  %v1450_v34 = vld [vmem:[%s1973_s1 + $0x24] sm:$0xf0]  ;;  %v1449_v35 = vld [vmem:[%s1973_s1 + $0x24] sm:$0xf]  ;;  %v1204_v36 = vld [vmem:[%s1973_s1 + $0x28] sm:$0xf0] }
  0x17   : > { %v1466_v37 = vld [vmem:[%s1975_s3 + $0x28] sm:$0xff]  ;;  %v1203_v38 = vor.u32 %v1450_v34, %v1202_v33  ;;  %v1207_v39 = vor.u32 %v1449_v35, %v1204_v36  ;;  %v1194_v40 = vld [vmem:[%s1973_s1 + $0x10] sm:$0xf]  ;;  %v1448_v41 = vld [vmem:[%s1973_s1 + $0x14] sm:$0xf0]  ;;  %s291_s13 = scalar_lea.vmem %s1972_s0, %s1509_s15  ;;  %v1854_v15 = vadd.s32 8, %v1848_v12  ;;  %v478_v20 = vadd.s32 %v477_v14, %v1848_v12 }
  0x18   : > { %733 = vmatpush.bf16.msra.mxu2 %v1467_v30  ;;  %v1447_v42 = vld [vmem:[%s1973_s1 + $0x14] sm:$0xf]  ;;  %v1196_v43 = vld [vmem:[%s1973_s1 + $0x18] sm:$0xf0]  ;;  %v1465_v44 = vld [vmem:[%s1975_s3 + $0x20] sm:$0xff]  ;;  %v1195_v45 = vor.u32 %v1448_v41, %v1194_v40  ;;  %s306_s8 = scalar_lea.vmem %s291_s13, %s1179_s14  ;;  %vm451_vm0 = vcmask 1043456  }
  0x19   : > { %419 = vmatpush.bf16.msra.mxu0 %v1227_v16  ;;  %v1199_v46 = vor.u32 %v1447_v42, %v1196_v43  ;;  %v1186_v47 = vld [vmem:[%s1973_s1] sm:$0xf]  ;;  %v1446_v48 = vld [vmem:[%s1973_s1 + $0x4] sm:$0xf0]  ;;  %v1445_v49 = vld [vmem:[%s1973_s1 + $0x4] sm:$0xf]  ;;  %v479_v23 = vadd.s32 %v477_v14, %v1854_v15 }
  0x1a   : > { %433 = vmatpush.bf16.msra.mxu1 %v1231_v17  ;;  %v1188_v50 = vld [vmem:[%s1973_s1 + $0x8] sm:$0xf0]  ;;  %v1187_v51 = vor.u32 %v1446_v48, %v1186_v47  ;;  %v1182_v52 = vld [vmem:[%s306_s8] sm:$0xf]  ;;  %v1444_v53 = vld [vmem:[%s306_s8] sm:$0x10] }
  0x1b   : > { %v1191_v54 = vor.u32 %v1445_v49, %v1188_v50  ;;  %v1484_v55 = vld [vmem:[%s1975_s3 + $0xb8] sm:$0xff]  ;;  %v1183_v56 = vor.u32 %v1444_v53, %v1182_v52  ;;  %v1483_v57 = vld [vmem:[%s1975_s3 + $0xb0] sm:$0xff]  ;;  %v1482_v60 = vld [vmem:[%s1975_s3 + $0xa8] sm:$0xff]  ;;  %v1593_v18 = vmov 1935823168   ;;  %vm481_vm1 = vcmp.ge.s32.totalorder %v478_v20, 0 }
  0x1c   : > { %734 = vmatpush.bf16.msra.mxu2 %v1466_v37  ;;  %v1475_v58 = vld [vmem:[%s1975_s3 + $0x70] sm:$0xff]  ;;  %v1464_v59 = vld [vmem:[%s1975_s3 + $0x18] sm:$0xff]  ;;  %v1474_v61 = vld [vmem:[%s1975_s3 + $0x68] sm:$0xff]  ;;  %v460_v19 = vunpack.c.l.s4 %v1593_v18  ;;  %vm484_vm2 = vcmp.lt.s32.totalorder %v478_v20, 32  ;;  %v1859_v27 = vadd.s32 16, %v1848_v12  ;;  %vm482_vm3 = vcmp.ge.s32.totalorder %v479_v23, 0 }
  0x1d   : > { %420 = vmatpush.bf16.msra.mxu0 %v1219_v22  ;;  %751 = vmatpush.bf16.msra.mxu3 %v1475_v58  ;;  %v1463_v62 = vld [vmem:[%s1975_s3 + $0x10] sm:$0xff]  ;;  %v1481_v63 = vld [vmem:[%s1975_s3 + $0xa0] sm:$0xff]  ;;  %v1462_v1 = vld [vmem:[%s1975_s3 + $0x8] sm:$0xff]  ;;  %vm485_vm4 = vcmp.lt.s32.totalorder %v479_v23, 32  ;;  %vm530_vm10 = vcmask 1046528   ;;  %s789_s8 = sadd.s32 4294967295, %s1248_s12 }
  0x1e   : > { %434 = vmatpush.bf16.msra.mxu1 %v1223_v25  ;;  %v1473_v0 = vld [vmem:[%s1975_s3 + $0x60] sm:$0xff]  ;;  %v1480_v2 = vld [vmem:[%s1975_s3 + $0x98] sm:$0xff]  ;;  %v1479_v5 = vld [vmem:[%s1975_s3 + $0x90] sm:$0xff]  ;;  %v461_v26 = vunpack.c.0.s8 %v460_v19  ;;  %v480_v33 = vadd.s32 %v477_v14, %v1859_v27  ;;  %vm512_vm11 = vsmask.f32 7424  ;;  %s1175_s12 = sshll.u32 %s1575_s24, 1 }
  0x1f   : > { %v1472_v3 = vld [vmem:[%s1975_s3 + $0x58] sm:$0xff]  ;;  %v1461_v4 = vld [vmem:[%s1975_s3] sm:$0xff]  ;;  %v1471_v6 = vld [vmem:[%s1975_s3 + $0x50] sm:$0xff]  ;;  %p295_p6 = scmp.lt.s32.totalorder %s1175_s12, 3  ;;  %s1176_s13 = sshll.u32 %s1991_s25, 2 }
  0x20   : > { %735 = vmatpush.bf16.msra.mxu2 %v1465_v44  ;;  %v1478_v7 = vld [vmem:[%s1975_s3 + $0x88] sm:$0xff]  ;;  %v1477_v10 = vld [vmem:[%s1975_s3 + $0x80] sm:$0xff]  ;;  %vm487_vm5 = vmand %vm481_vm1, %vm484_vm2  ;;  %vm483_vm7 = vcmp.ge.s32.totalorder %v480_v33, 0  ;;  %vm486_vm8 = vcmp.lt.s32.totalorder %v480_v33, 32 }
  0x21   : > { %421 = vmatpush.bf16.msra.mxu0 %v1211_v31  ;;  %752 = vmatpush.bf16.msra.mxu3 %v1474_v61  ;;  %v1470_v8 = vld [vmem:[%s1975_s3 + $0x48] sm:$0xff]  ;;  %v1469_v11 = vld [vmem:[%s1975_s3 + $0x40] sm:$0xff]  ;;  %vm488_vm6 = vmand %vm482_vm3, %vm485_vm4  ;;  %s1993_s12 = smov (!%p295_p6, %s1175_s12), 3 }
  0x22   : > { %435 = vmatpush.bf16.msra.mxu1 %v1215_v32  ;;  %v325_v13 = vld [vmem:[%s1974_s2] sm:$0x3]  ;;  %vm489_vm9 = vmand %vm483_vm7, %vm486_vm8  ;;  %v1499_v9 = vld [vmem:[%s1977_s5 + $0x70] sm:$0xff]  ;;  %s298_s14 = sadd.s32 %s1176_s13, %s1993_s12 }
  0x23   : > { %v327_v16 = vperm.slane %v325_v13, 0  ;;  %v328_v17 = vperm.slane %v325_v13, 1  ;;  %v1498_v13 = vld [vmem:[%s1977_s5 + $0x68] sm:$0xff]  ;;  %v1505_v14 = vld [vmem:[%s1977_s5 + $0xa0] sm:$0xff]  ;;  %v1504_v18 = vld [vmem:[%s1977_s5 + $0x98] sm:$0xff]  ;;  %s1177_s16 = sshll.u32 %s298_s14, 3 }
  0x24   : > { %736 = vmatpush.bf16.msra.mxu2 %v1464_v59  ;;  %v1485_v19 = vld [vmem:[%s1977_s5] sm:$0xff]  ;;  %v1496_v20 = vld [vmem:[%s1977_s5 + $0x58] sm:$0xff]  ;;  %v1495_v23 = vld [vmem:[%s1977_s5 + $0x50] sm:$0xff]  ;;  %s300_s24 = scalar_lea.vmem %s1979_s7, %s1177_s16 }
  0x25   : > { %422 = vmatpush.bf16.msra.mxu0 %v1203_v38  ;;  %753 = vmatpush.bf16.msra.mxu3 %v1473_v0 }
  0x26   : > { %436 = vmatpush.bf16.msra.mxu1 %v1207_v39 }
  0x28   : > { %737 = vmatpush.bf16.msra.mxu2 %v1463_v62 }
  0x29   : > { %423 = vmatpush.bf16.msra.mxu0 %v1195_v45  ;;  %754 = vmatpush.bf16.msra.mxu3 %v1472_v3  ;;  %v1490_v3 = vld [vmem:[%s1977_s5 + $0x28] sm:$0xff] }
  0x2a   : > { %437 = vmatpush.bf16.msra.mxu1 %v1199_v46 }
  0x2c   : > { %738 = vmatpush.bf16.msra.mxu2 %v1462_v1  ;;  %v1492_v1 = vld [vmem:[%s1977_s5 + $0x38] sm:$0xff] }
  0x2d   : > { %424 = vmatpush.bf16.msra.mxu0 %v1187_v51  ;;  %755 = vmatpush.bf16.msra.mxu3 %v1471_v6  ;;  %v1500_v6 = vld [vmem:[%s1977_s5 + $0x78] sm:$0xff] }
  0x2e   : > { %438 = vmatpush.bf16.msra.mxu1 %v1191_v54 }
  0x30   : > { %425 = vmatmul.bf16.vlgmr.msra.gmra.mxu0 %v1183_v56  ;;  %739 = vmatpush.bf16.msra.mxu2 %v1461_v4  ;;  %v1508_v4 = vld [vmem:[%s1977_s5 + $0xb8] sm:$0xff] }
  0x31   : > { %768 = vmatpush.bf16.msrb.mxu0 %v1484_v55  ;;  %439 = vmatmul.bf16.vlgmr.msra.gmra.mxu1 %v1183_v56 }
  0x32   : > { %756 = vmatpush.bf16.msra.mxu3 %v1470_v8  ;;  %1037 = vmatpush.bf16.msrb.mxu1 %v1492_v1  ;;  %v1488_v8 = vld [vmem:[%s1977_s5 + $0x18] sm:$0xff] }
  0x34   : > { %1051 = vmatpush.bf16.msrb.mxu2 %v1500_v6 }
  0x35   : > { %769 = vmatpush.bf16.msrb.mxu0 %v1483_v57 }
  0x36   : > { %757 = vmatpush.bf16.msra.mxu3 %v1469_v11  ;;  %v1487_v11 = vld [vmem:[%s1977_s5 + $0x10] sm:$0xff] }
  0x38   : > { %1052 = vmatpush.bf16.msrb.mxu2 %v1499_v9 }
  0x39   : > { %770 = vmatpush.bf16.msrb.mxu0 %v1482_v60 }
  0x3a   : > { %1065 = vmatpush.bf16.msrb.mxu3 %v1508_v4 }
  0x3c   : > { %1053 = vmatpush.bf16.msrb.mxu2 %v1498_v13  ;;  %v1552_v13 = vld [vmem:[%s1978_s6] ss:$0 sm:$0xff] }
  0x3d   : > { %771 = vmatpush.bf16.msrb.mxu0 %v1481_v63 }
  0x41   : > { %772 = vmatpush.bf16.msrb.mxu0 %v1480_v2  ;;  %v1491_v2 = vld [vmem:[%s1977_s5 + $0x30] sm:$0xff] }
  0x42   : > { %1038 = vmatpush.bf16.msrb.mxu1 %v1491_v2 }
  0x45   : > { %773 = vmatpush.bf16.msrb.mxu0 %v1479_v5  ;;  %v1489_v5 = vld [vmem:[%s1977_s5 + $0x20] sm:$0xff] }
  0x46   : > { %1039 = vmatpush.bf16.msrb.mxu1 %v1490_v3 }
  0x49   : > { %774 = vmatpush.bf16.msrb.mxu0 %v1478_v7  ;;  %v1507_v7 = vld [vmem:[%s1977_s5 + $0xb0] sm:$0xff] }
  0x4a   : > { %1040 = vmatpush.bf16.msrb.mxu1 %v1489_v5  ;;  %1066 = vmatpush.bf16.msrb.mxu3 %v1507_v7 }
  0x4d   : > { %775 = vmatpush.bf16.msrb.mxu0 %v1477_v10  ;;  %v1506_v10 = vld [vmem:[%s1977_s5 + $0xa8] sm:$0xff] }
  0x4e   : > { %1041 = vmatpush.bf16.msrb.mxu1 %v1488_v8  ;;  %1067 = vmatpush.bf16.msrb.mxu3 %v1506_v10 }
  0x52   : > { %1042 = vmatpush.bf16.msrb.mxu1 %v1487_v11  ;;  %1068 = vmatpush.bf16.msrb.mxu3 %v1505_v14 }
  0x56   : > { %1069 = vmatpush.bf16.msrb.mxu3 %v1504_v18 }
  0xad   : > { %v426_v21 = vpop.f32.mrf.mxu0 }
  0xae   : > { %v440_v22 = vpop.f32.mrf.mxu1  ;;  %v427_v24 = vadd.f32 %v426_v21, %v327_v16  ;;  %v1503_v21 = vld [vmem:[%s1977_s5 + $0x90] sm:$0xff] }
  0xaf   : > { %v441_v25 = vadd.f32 %v440_v22, %v328_v17  ;;  %1070 = vmatpush.bf16.msrb.mxu3 %v1503_v21 }
  0xb1   : > { %v449_v28 = vrot.slane %v441_v25, 4  ;;  %v1502_v25 = vld [vmem:[%s1977_s5 + $0x88] sm:$0xff] }
  0xb3   : > { %v452_v29 = vsel %vm451_vm0, %v427_v24, %v449_v28  ;;  %v453_v30 = vsel %vm451_vm0, %v449_v28, %v427_v24  ;;  %1071 = vmatpush.bf16.msrb.mxu3 %v1502_v25  ;;  %v1551_v28 = vld [vmem:[%s1976_s4] ss:$0 sm:$0xff] }
  0xb4   : > { %v454_v31 = vrot.slane %v453_v30, 4  ;;  %v462_v32 = vperm.slane %v452_v29, %v461_v26  ;;  %v1501_v29 = vld [vmem:[%s1977_s5 + $0x80] sm:$0xff] }
  0xb5   : > { %v428_v36 = vpop.f32.mrf.mxu0  ;;  %v1493_v30 = vld [vmem:[%s1977_s5 + $0x40] sm:$0xff] }
  0xb6   : > { %v466_v34 = vperm.slane %v454_v31, %v461_v26  ;;  %v496_v35 = vsel %vm487_vm5, %v462_v32, 0.0  ;;  %v442_v37 = vpop.f32.mrf.mxu1  ;;  %v429_v41 = vadd.f32 %v428_v36, %v327_v16  ;;  %v1486_v16 = vld [vmem:[%s1977_s5 + $0x8] sm:$0xff]  ;;  %v790_v32 = vstv %s789_s8 }
  0xb7   : > { %v499_v38 = vpack.c.bf16 %v496_v35, %v496_v35  ;;  %v443_v39 = vadd.f32 %v442_v37, %v328_v17  ;;  %v1497_v17 = vld [vmem:[%s1977_s5 + $0x60] sm:$0xff]  ;;  %1043 = vmatpush.bf16.msrb.mxu1 %v1486_v16  ;;  %1072 = vmatpush.bf16.msrb.mxu3 %v1501_v29  ;;  %v791_v37 = vadd.s32 %v790_v32, %v1848_v12 }
  0xb8   : > { %v497_v40 = vsel %vm488_vm6, %v466_v34, 0.0  ;;  %1054 = vmatpush.bf16.msrb.mxu2 %v1497_v17  ;;  %v793_v12 = vadd.s32 %v790_v32, %v1859_v27 }
  0xb9   : > { %v450_v42 = vrot.slane %v443_v39, 4  ;;  %v500_v43 = vpack.c.bf16 %v497_v40, %v497_v40  ;;  %v505_v44 = vunpack.c.l.b16 %v499_v38  ;;  %vm794_vm12 = vcmp.ge.s32.totalorder %v791_v37, 0 }
  0xba   : > { %vm797_vm13 = vcmp.lt.s32.totalorder %v791_v37, 32  ;;  %v792_v40 = vadd.s32 %v790_v32, %v1854_v15  ;;  %vm796_vm2 = vcmp.ge.s32.totalorder %v793_v12, 0  ;;  %vm799_vm3 = vcmp.lt.s32.totalorder %v793_v12, 32 }
  0xbb   : > { %v455_v45 = vsel %vm451_vm0, %v429_v41, %v450_v42  ;;  %v506_v46 = vunpack.c.l.b16 %v500_v43  ;;  %1044 = vmatpush.bf16.msrb.mxu1 %v1485_v19  ;;  %vm800_vm14 = vmand %vm794_vm12, %vm797_vm13 }
  0xbc   : > { %v470_v47 = vperm.slane %v455_v45, %v461_v26  ;;  %1055 = vmatpush.bf16.msrb.mxu2 %v1496_v20  ;;  %v1494_v26 = vld [vmem:[%s1977_s5 + $0x48] sm:$0xff]  ;;  %vm795_vm15 = vcmp.ge.s32.totalorder %v792_v40, 0  ;;  %vm798_vm0 = vcmp.lt.s32.totalorder %v792_v40, 32  ;;  %vm802_vm4 = vmand %vm796_vm2, %vm799_vm3 }
  0xbd   : > { %v508_v48 = vpack.c.b16 %v506_v46, %v505_v44  ;;  %vm801_vm1 = vmand %vm795_vm15, %vm798_vm0 }
  0xbe   : > { %v498_v49 = vsel %vm489_vm9, %v470_v47, 0.0 }
  0xbf   : > { %v501_v50 = vpack.c.bf16 %v498_v49, %v498_v49  ;;  %740 = vmatmul.bf16.vlgmr.msra.gmra.mxu2 %v508_v48  ;;  %v516_v51 = vshll.u32 %v508_v48, 16  ;;  %v531_v55 = vrot.slane %v508_v48, 1  ;;  %v514_v57 = vshrl.u32 %v508_v48, 16 }
  0xc0   : > { %1056 = vmatpush.bf16.msrb.mxu2 %v1495_v23 }
  0xc1   : > { %v507_v52 = vunpack.c.l.b16 %v501_v50  ;;  %v518_v54 = vrot.slane %v516_v51, 1 }
  0xc3   : > { %v509_v53 = vpack.c.b16 %v507_v52, %v507_v52  ;;  %v519_v60 = vor.u32 %v518_v54, %v514_v57 }
  0xc4   : > { %1057 = vmatpush.bf16.msrb.mxu2 %v1494_v26 }
  0xc5   : > { %v532_v56 = vrot.slane %v509_v53, 1  ;;  %v521_v58 = vshll.u32 %v509_v53, 16  ;;  %v525_v63 = vshrl.u32 %v509_v53, 16 }
  0xc7   : > { %v533_v59 = vsel %vm530_vm10, %v531_v55, %v532_v56  ;;  %v523_v61 = vrot.slane %v521_v58, 1 }
  0xc8   : > { %776 = vmatmul.bf16.vlgmr.msrb.gmra.mxu0 %v533_v59  ;;  %1058 = vmatpush.bf16.msrb.mxu2 %v1493_v30 }
  0xc9   : > { %v524_v62 = vsel %vm512_vm11, %v519_v60, %v523_v61  ;;  %v527_v0 = vor.u32 %v525_v63, %v523_v61 }
  0xca   : > { %758 = vmatmul.bf16.vlgmr.msra.gmra.mxu3 %v524_v62 }
  0xcf   : > { %745 = vmatmul.bf16.gmra.mxu2 %v509_v53 }
  0xd8   : > { %781 = vmatmul.bf16.gmra.mxu0 %v532_v56 }
  0xda   : > { %763 = vmatmul.bf16.gmra.mxu3 %v527_v0 }
 0x142   : > { %v741_v22 = vpop.f32.mrf.mxu2 }
 0x143   : > { %v742_v33 = vadd.f32 %v1551_v28, %v741_v22 }
 0x145   : > { %v777_v24 = vpop.f32.mrf.mxu0 }
 0x14a   : > { %v743_v31 = vpop.f32.mrf.mxu2 }
 0x14b   : > { %v744_v41 = vadd.f32 %v1551_v28, %v743_v31 }
 0x14d   : > { %v759_v34 = vpop.f32.mrf.mxu3  ;;  %v779_v35 = vpop.f32.mrf.mxu0 }
 0x14e   : > { %v760_v36 = vadd.f32 %v759_v34, %v742_v33 }
 0x150   : > { %v778_v38 = vadd.f32 %v777_v24, %v760_v36 }
 0x152   : > { %v746_v39 = vpop.f32.mrf.mxu2  ;;  %v786_v42 = vmax.f32 %v778_v38, 0.0 }
 0x153   : > { %v747_v51 = vadd.f32 %v1551_v28, %v746_v39 }
 0x154   : > { %v809_v46 = vsel %vm800_vm14, %v786_v42, 0.0 }
 0x155   : > { %v761_v43 = vpop.f32.mrf.mxu3  ;;  %v782_v44 = vpop.f32.mrf.mxu0  ;;  %v812_v50 = vpack.c.bf16 %v809_v46, %v809_v46 }
 0x156   : > { %v762_v45 = vadd.f32 %v761_v43, %v744_v41 }
 0x157   : > { %v817_v56 = vunpack.c.l.b16 %v812_v50 }
 0x158   : > { %v780_v47 = vadd.f32 %v779_v35, %v762_v45 }
 0x15a   : > { %v787_v48 = vmax.f32 %v780_v47, 0.0  ;;  %v748_v49 = vpop.f32.mrf.mxu2 }
 0x15c   : > { %v810_v52 = vsel %vm801_vm1, %v787_v48, 0.0 }
 0x15d   : > { %v813_v53 = vpack.c.bf16 %v810_v52, %v810_v52  ;;  %v764_v15 = vpop.f32.mrf.mxu3  ;;  %v784_v54 = vpop.f32.mrf.mxu0 }
 0x15e   : > { %v765_v55 = vadd.f32 %v764_v15, %v747_v51 }
 0x15f   : > { %v818_v57 = vunpack.c.l.b16 %v813_v53 }
 0x160   : > { %v783_v58 = vadd.f32 %v782_v44, %v765_v55 }
 0x161   : > { %v819_v59 = vpack.c.b16 %v818_v57, %v817_v56 }
 0x162   : > { %v788_v60 = vmax.f32 %v783_v58, 0.0 }
 0x163   : > { %1045 = vmatmul.bf16.vlgmr.msrb.gmra.mxu1 %v819_v59  ;;  %v827_v63 = vshll.u32 %v819_v59, 16  ;;  %v837_v3 = vrot.slane %v819_v59, 1  ;;  %v825_v5 = vshrl.u32 %v819_v59, 16 }
 0x164   : > { %v811_v61 = vsel %vm802_vm4, %v788_v60, 0.0 }
 0x165   : > { %v814_v62 = vpack.c.bf16 %v811_v61, %v811_v61  ;;  %v766_v27 = vpop.f32.mrf.mxu3  ;;  %v829_v2 = vrot.slane %v827_v63, 1 }
 0x167   : > { %v822_v0 = vunpack.c.l.b16 %v814_v62  ;;  %v830_v8 = vor.u32 %v829_v2, %v825_v5 }
 0x169   : > { %v823_v1 = vpack.c.b16 %v822_v0, %v822_v0 }
 0x16b   : > { %v838_v4 = vrot.slane %v823_v1, 1  ;;  %v832_v6 = vshll.u32 %v823_v1, 16 }
 0x16d   : > { %v839_v7 = vsel %vm530_vm10, %v837_v3, %v838_v4  ;;  %v834_v9 = vrot.slane %v832_v6, 1 }
 0x16e   : > { %1073 = vmatmul.bf16.vlgmr.msrb.gmra.mxu3 %v839_v7 }
 0x16f   : > { %v835_v10 = vsel %vm512_vm11, %v830_v8, %v834_v9 }
 0x170   : > { %1059 = vmatmul.bf16.vlgmr.msrb.gmra.mxu2 %v835_v10 }
 0x1e0   : > { %v1046_v11 = vpop.f32.mrf.mxu1 }
 0x1e1   : > { %v1047_v14 = vadd.f32 %v1552_v13, %v1046_v11 }
 0x1e8   : > { %v1048_v20 = vpop.f32.mrf.mxu1 }
 0x1e9   : > { %v1049_v22 = vadd.f32 %v1552_v13, %v1048_v20 }
 0x1f1   : > { %v1074_v16 = vpop.f32.mrf.mxu3 }
 0x1f3   : > { %v1060_v17 = vpop.f32.mrf.mxu2 }
 0x1f4   : > { %v1061_v18 = vadd.f32 %v1060_v17, %v1047_v14 }
 0x1f6   : > { %v1075_v19 = vadd.f32 %v1074_v16, %v1061_v18 }
 0x1f8   : > { %v1079_v21 = vmax.f32 %v1075_v19, 0.0 }
 0x1f9   : > { %v1076_v25 = vpop.f32.mrf.mxu3 }
 0x1fa   : > { %1081 = vst [vmem:[%s300_s24] sm:$0xff] %v1079_v21 }
 0x1fb   : > { %v1062_v23 = vpop.f32.mrf.mxu2 }
 0x1fc   : > { %v1063_v24 = vadd.f32 %v1062_v23, %v1049_v22 }
 0x1fe   : > { %v1077_v26 = vadd.f32 %v1076_v25, %v1063_v24 }
 0x200   : > { %v1080_v28 = vmax.f32 %v1077_v26, 0.0 }
 0x202   : > { %1082 = vst [vmem:[%s300_s24 + $0x8] sm:$0xff] %v1080_v28 }
 0x203 PF: > { %s17_s28 = sadd.s32 1, %s1591_s28   ;;  %s1980_s24 = smov %s1583_s26 }
 0x204   : > { %p14_p7 = scmp.ge.s32.totalorder %s17_s28, 6   ;;  %s1981_s25 = smov %s1587_s27 }
 0x205   : > { %s1982_s26 = smov %s1985_s29  ;;  %s1983_s27 = smov %s1989_s30 }
 0x206   :  { %16 = sbr.rel (!%p14_p7) target bundleno = 3 (0x3), region = 79 }

</bundles_post_ra>
